<compile_context>
chip_gen: v7x
topology: tpu7x:2x2x1
jax: 0.10.0
libtpu: 0.0.40
codegen_flags: <defaults>
</compile_context>

<pallas_src>
import jax
import jax.numpy as jnp
from jax.experimental import pallas as pl
from jax.experimental.pallas import tpu as pltpu


# ------------------------------------------------------------------ helpers --

def _round_up(x, m):
    return (x + m - 1) // m * m


def _pick_tile(dim, pref):
    """Largest tile <= pref that is the full dim or a 128-granular divisor."""
    if dim <= pref:
        return dim
    for cand in (pref, 1024, 512, 256, 128):
        if cand <= pref and dim % cand == 0:
            return cand
    return None


def _gather_tb(n, token_block, dtype):
    """Token-block size: big enough to amortize step overhead, small enough to
    keep >=2 grid steps for small N (v7x has 2 TensorCores), sublane-aligned
    for the table dtype."""
    g = 8 if jnp.dtype(dtype).itemsize >= 4 else 16
    ng = _round_up(max(n, 1), g)
    half = max(g, _round_up(ng // 2, g))
    return max(g, min(token_block, half, ng))


# ------------------------------------------------------------------ kernels --

def _embed_pos_kernel(tok_ref, pos_ref, npd_ref, emb_hbm, pos_hbm, out_ref,
                      pbuf, sems):
    # TB tokens per grid step:  out = emb[tok] + pos_emb[pos] * not_pad
    # Embedding rows are DMA'd straight into the output block; positional rows
    # go into pbuf and are fused with a single vectorized addcmul.
    i = pl.program_id(0)
    tb = out_ref.shape[0]
    base = i * tb

    copies = []
    for r in range(tb):                      # static -> unrolled DMA issue
        t = tok_ref[base + r]                # SMEM scalar reads before waits
        p = pos_ref[base + r]
        ce = pltpu.make_async_copy(emb_hbm.at[pl.ds(t, 1)],
                                   out_ref.at[pl.ds(r, 1)], sems.at[0, r])
        cp = pltpu.make_async_copy(pos_hbm.at[pl.ds(p, 1)],
                                   pbuf.at[pl.ds(r, 1)], sems.at[1, r])
        ce.start()
        cp.start()
        copies.append((ce, cp))
    for ce, cp in copies:                    # all DMAs in flight before waits
        ce.wait()
        cp.wait()

    out_ref[...] = (out_ref[...] + pbuf[...] * npd_ref[...]).astype(out_ref.dtype)


def _embed_kernel(tok_ref, emb_hbm, out_ref, sems):
    # TB tokens per grid step:  out = emb[tok]  (rows DMA'd directly into out)
    i = pl.program_id(0)
    tb = out_ref.shape[0]
    base = i * tb

    copies = []
    for r in range(tb):
        t = tok_ref[base + r]
        c = pltpu.make_async_copy(emb_hbm.at[pl.ds(t, 1)],
                                  out_ref.at[pl.ds(r, 1)], sems.at[r])
        c.start()
        copies.append(c)
    for c in copies:
        c.wait()


def _head_kernel(x_ref, wt_ref, o_ref):
    o_ref[...] = jnp.dot(x_ref[...], wt_ref[...],
                         preferred_element_type=jnp.float32).astype(o_ref.dtype)


def _head_bias_kernel(x_ref, wt_ref, b_ref, o_ref):
    o_ref[...] = (jnp.dot(x_ref[...], wt_ref[...],
                          preferred_element_type=jnp.float32)
                  + b_ref[...]).astype(o_ref.dtype)


def _head_acc_kernel(x_ref, wt_ref, o_ref, acc_ref):
    @pl.when(pl.program_id(2) == 0)
    def _():
        acc_ref[...] = jnp.zeros_like(acc_ref)

    acc_ref[...] += jnp.dot(x_ref[...], wt_ref[...],
                            preferred_element_type=jnp.float32)

    @pl.when(pl.program_id(2) == pl.num_programs(2) - 1)
    def _():
        o_ref[...] = acc_ref[...].astype(o_ref.dtype)


def _head_acc_bias_kernel(x_ref, wt_ref, b_ref, o_ref, acc_ref):
    @pl.when(pl.program_id(2) == 0)
    def _():
        acc_ref[...] = jnp.zeros_like(acc_ref)

    acc_ref[...] += jnp.dot(x_ref[...], wt_ref[...],
                            preferred_element_type=jnp.float32)

    @pl.when(pl.program_id(2) == pl.num_programs(2) - 1)
    def _():
        o_ref[...] = (acc_ref[...] + b_ref[...]).astype(o_ref.dtype)


# ----------------------------------------------------------------- wrappers --

_GATHER_VMEM = 48 * 1024 * 1024
_HEAD_VMEM = 48 * 1024 * 1024


def _gather_embed_pos(tok, pos, npd, emb_tbl, pos_tbl, tb):
    n = tok.shape[0]                # already padded to a multiple of tb
    d = emb_tbl.shape[1]
    gs = pltpu.PrefetchScalarGridSpec(
        num_scalar_prefetch=2,      # tok, pos -> SMEM
        grid=(n // tb,),
        in_specs=[
            pl.BlockSpec((tb, 1), lambda i, tok, pos: (i, 0)),   # not-pad mask
            pl.BlockSpec(memory_space=pl.ANY),                   # emb table (HBM)
            pl.BlockSpec(memory_space=pl.ANY),                   # pos table (HBM)
        ],
        out_specs=pl.BlockSpec((tb, d), lambda i, tok, pos: (i, 0)),
        scratch_shapes=[
            pltpu.VMEM((tb, d), pos_tbl.dtype),
            pltpu.SemaphoreType.DMA((2, tb)),
        ],
    )
    return pl.pallas_call(
        _embed_pos_kernel,
        grid_spec=gs,
        out_shape=jax.ShapeDtypeStruct((n, d), emb_tbl.dtype),
        compiler_params=pltpu.CompilerParams(
            dimension_semantics=("parallel",),
            vmem_limit_bytes=_GATHER_VMEM),
    )(tok, pos, npd, emb_tbl, pos_tbl)


def _gather_embed(tok, emb_tbl, tb):
    n = tok.shape[0]
    d = emb_tbl.shape[1]
    gs = pltpu.PrefetchScalarGridSpec(
        num_scalar_prefetch=1,      # tok -> SMEM
        grid=(n // tb,),
        in_specs=[pl.BlockSpec(memory_space=pl.ANY)],            # emb table (HBM)
        out_specs=pl.BlockSpec((tb, d), lambda i, tok: (i, 0)),
        scratch_shapes=[pltpu.SemaphoreType.DMA((tb,))],
    )
    return pl.pallas_call(
        _embed_kernel,
        grid_spec=gs,
        out_shape=jax.ShapeDtypeStruct((n, d), emb_tbl.dtype),
        compiler_params=pltpu.CompilerParams(
            dimension_semantics=("parallel",),
            vmem_limit_bytes=_GATHER_VMEM),
    )(tok, emb_tbl)


def _head_matmul(x, w_t, bias_row, *, tn, tk, out_dtype, tm_pref=512):
    n, e = x.shape                  # e == padded emb_dim, divisible by tk
    v = w_t.shape[1]                # padded vocab, divisible by tn
    tm = min(tm_pref, _round_up(n, 8))
    n_pad = _round_up(n, tm)
    if n_pad != n:
        x = jnp.pad(x, ((0, n_pad - n), (0, 0)))
    has_bias = bias_row is not None
    k_steps = e // tk

    if k_steps == 1:
        # x tile index is constant over the vocab axis -> stays VMEM-resident;
        # no reduction axis, no f32 accumulator scratch.
        grid = (n_pad // tm, v // tn)
        in_specs = [pl.BlockSpec((tm, tk), lambda i, j: (i, 0)),
                    pl.BlockSpec((tk, tn), lambda i, j: (0, j))]
        if has_bias:
            in_specs.append(pl.BlockSpec((1, tn), lambda i, j: (0, j)))
        out_specs = pl.BlockSpec((tm, tn), lambda i, j: (i, j))
        kernel = _head_bias_kernel if has_bias else _head_kernel
        scratch = []
        dims = ("parallel", "parallel")
    else:
        grid = (n_pad // tm, v // tn, k_steps)
        in_specs = [pl.BlockSpec((tm, tk), lambda i, j, k: (i, k)),
                    pl.BlockSpec((tk, tn), lambda i, j, k: (k, j))]
        if has_bias:
            in_specs.append(pl.BlockSpec((1, tn), lambda i, j, k: (0, j)))
        out_specs = pl.BlockSpec((tm, tn), lambda i, j, k: (i, j))
        kernel = _head_acc_bias_kernel if has_bias else _head_acc_kernel
        scratch = [pltpu.VMEM((tm, tn), jnp.float32)]
        dims = ("parallel", "parallel", "arbitrary")

    args = (x, w_t) + ((bias_row,) if has_bias else ())
    out = pl.pallas_call(
        kernel,
        out_shape=jax.ShapeDtypeStruct((n_pad, v), out_dtype),
        grid_spec=pltpu.PrefetchScalarGridSpec(
            num_scalar_prefetch=0,
            grid=grid,
            in_specs=in_specs,
            out_specs=out_specs,
            scratch_shapes=scratch),
        compiler_params=pltpu.CompilerParams(
            dimension_semantics=dims,
            vmem_limit_bytes=_HEAD_VMEM),
    )(*args)
    return out if n_pad == n else out[:n]


# ------------------------------------------------------------------- module --

class TPWordEmbedding:
    """JAX/Pallas re-implementation of fms TPWordEmbedding.

    Tensor parallelism is simulated in-process: emb/pos_emb are conceptually
    sharded along emb_dim and the head colwise along vocab, with the all-gather
    being a last-dim concat.  Since concat(split(W)) == W the kernels run once
    on fused full tables — numerically identical, but without per-shard kernel
    launches or output concatenation passes.
    """

    _TN_PREF = 512
    _TK_PREF = 512

    def __init__(self, vocab_size, emb_dim, padding_idx=None, max_pos=512,
                 abs_pos=False, reversible=True, tie_weights=True, bias=False,
                 world_size=1, key=None, token_block=64,
                 param_dtype=jnp.float32, logits_dtype=None):
        assert emb_dim % world_size == 0, "emb_dim must be divisible by world size"
        assert vocab_size % world_size == 0, "vocab_size must be divisible by world size"
        assert reversible or not tie_weights, "weights cannot be tied without output head"
        assert token_block % 8 == 0, "token_block must be a multiple of 8"

        self.vocab_size = vocab_size
        self.emb_dim = emb_dim
        if padding_idx is not None:
            padding_idx = padding_idx if 0 <= padding_idx < vocab_size else None
        self.padding_idx = padding_idx
        self.abs_pos = abs_pos
        self.reversible = reversible
        self.tie_weights = tie_weights
        self.bias = bias
        self.max_pos = max_pos
        self.world_size = world_size
        self._token_block = token_block
        self._param_dtype = param_dtype
        self._logits_dtype = logits_dtype if logits_dtype is not None else param_dtype

        if key is None:
            key = jax.random.PRNGKey(0)
        k_emb, k_pos, k_head = jax.random.split(key, 3)
        std = emb_dim ** (-0.5)

        emb_w = jax.random.truncated_normal(
            k_emb, -2.0, 2.0, (vocab_size, emb_dim), jnp.float32) * std
        if self.padding_idx is not None:
            emb_w = emb_w.at[self.padding_idx].set(0.0)
        # Fused full table (== concat of the world_size embedding-dim shards).
        self.emb_full = emb_w.astype(param_dtype)

        if abs_pos:
            pos_w = jax.random.truncated_normal(
                k_pos, -2.0, 2.0, (max_pos, emb_dim), jnp.float32) * std
            self.pos_full = pos_w.astype(param_dtype)

        if reversible:
            if tie_weights:
                head_w = emb_w
            else:
                head_w = jax.random.truncated_normal(
                    k_head, -2.0, 2.0, (vocab_size, emb_dim), jnp.float32) * std

            # --- head tiling decided once, weight padded once at init -------
            tn = _pick_tile(vocab_size, self._TN_PREF)
            if tn is None:                                  # odd vocab (e.g. 50257)
                v_pad, tn = _round_up(vocab_size, self._TN_PREF), self._TN_PREF
            else:
                v_pad = vocab_size
            if emb_dim <= 2048:
                tk, e_pad = emb_dim, emb_dim                # no reduction axis
            else:
                tk = _pick_tile(emb_dim, self._TK_PREF)
                if tk is None:
                    e_pad, tk = _round_up(emb_dim, self._TK_PREF), self._TK_PREF
                else:
                    e_pad = emb_dim
            self._head_tn, self._head_tk = tn, tk
            self._head_vpad, self._head_epad = v_pad, e_pad

            w_t = head_w.T                                   # (E, V), transposed once
            if (e_pad, v_pad) != w_t.shape:
                w_t = jnp.pad(w_t, ((0, e_pad - emb_dim), (0, v_pad - vocab_size)))
            self.head_wt = jnp.asarray(w_t, dtype=param_dtype)
            if bias:
                # torch reset_params() zero-inits the bias parameter.
                self.head_bias = jnp.zeros((1, v_pad), jnp.float32)
            else:
                self.head_bias = None                        # operand skipped entirely

    def forward(self, inp, reverse=False):
        if not reverse:
            b, s = inp.shape
            n = b * s
            tb = _gather_tb(n, self._token_block, self.emb_full.dtype)
            n_pad = _round_up(n, tb)
            tok = inp.reshape(-1).astype(jnp.int32)
            if n_pad != n:
                tok = jnp.pad(tok, (0, n_pad - n))
            if self.abs_pos:
                if self.padding_idx is not None:
                    is_pad = inp == self.padding_idx
                else:
                    is_pad = jnp.zeros_like(inp, dtype=bool)
                pos = jnp.arange(s, dtype=jnp.int32)[None, :] - jnp.cumsum(
                    is_pad.astype(jnp.int32), axis=1)
                pos = jnp.maximum(pos, 0)
                pos_flat = pos.reshape(-1).astype(jnp.int32)
                npd = (~is_pad).reshape(-1, 1).astype(jnp.float32)
                if n_pad != n:
                    pos_flat = jnp.pad(pos_flat, (0, n_pad - n))
                    npd = jnp.pad(npd, ((0, n_pad - n), (0, 0)))
                out = _gather_embed_pos(tok, pos_flat, npd,
                                        self.emb_full, self.pos_full, tb)
            else:
                out = _gather_embed(tok, self.emb_full, tb)
            if n_pad != n:
                out = out[:n]
            return out.reshape(b, s, self.emb_dim)
        else:
            assert self.reversible, "no output head"
            b, s, e = inp.shape
            x = inp.reshape(-1, e).astype(self.head_wt.dtype)
            if self._head_epad != e:
                x = jnp.pad(x, ((0, 0), (0, self._head_epad - e)))
            logits = _head_matmul(x, self.head_wt, self.head_bias,
                                  tn=self._head_tn, tk=self._head_tk,
                                  out_dtype=self._logits_dtype)
            if self._head_vpad != self.vocab_size:
                logits = logits[:, :self.vocab_size]
            return logits.reshape(b, s, self.vocab_size)


# --------------------------------------------------------------------- main --

if __name__ == "__main__":
    B, S = 2, 8
    VOCAB, EMB = 64, 32
    WORLD = 2
    MAX_POS = 16
    PAD = 0

    key = jax.random.PRNGKey(0)
    k_inp, k1, k2, k3 = jax.random.split(key, 4)

    inp = jax.random.randint(k_inp, (B, S), 0, VOCAB, dtype=jnp.int32)

    # --- variant 1: abs-pos + padding idx + untied head + (zero-init) bias ---
    mod = TPWordEmbedding(VOCAB, EMB, padding_idx=PAD, max_pos=MAX_POS,
                          abs_pos=True, reversible=True, tie_weights=False,
                          bias=True, world_size=WORLD, key=k1)
    out = mod.forward(inp)                    # (B, S, EMB)
    logits = mod.forward(out, reverse=True)   # (B, S, VOCAB)
    jax.block_until_ready((out, logits))

    ref = jnp.take(mod.emb_full, inp, axis=0)
    is_pad = inp == PAD
    pos = jnp.maximum(
        jnp.arange(S, dtype=jnp.int32)[None, :]
        - jnp.cumsum(is_pad.astype(jnp.int32), axis=1), 0)
    ref = ref + jnp.take(mod.pos_full, pos, axis=0) * (~is_pad)[..., None].astype(jnp.float32)
    ref_logits = ref @ mod.head_wt[:EMB, :VOCAB]

    assert out.shape == (B, S, EMB) and logits.shape == (B, S, VOCAB)
    assert jnp.allclose(out, ref, atol=1e-5), "forward (embedding) mismatch"
    assert jnp.allclose(logits, ref_logits, atol=1e-4), "reverse (head) mismatch"

    # --- variant 2: no positional, tied weights, no bias ---------------------
    mod2 = TPWordEmbedding(VOCAB, EMB, padding_idx=None, abs_pos=False,
                           reversible=True, tie_weights=True, bias=False,
                           world_size=1, key=k2)
    out2 = mod2.forward(inp)
    logits2 = mod2.forward(out2, reverse=True)
    jax.block_until_ready((out2, logits2))
    assert jnp.allclose(out2, jnp.take(mod2.emb_full, inp, axis=0), atol=1e-5), \
        "forward (tied, no-pos) mismatch"
    assert jnp.allclose(logits2, out2 @ mod2.head_wt[:EMB, :VOCAB], atol=1e-4), \
        "reverse (tied) mismatch"

    # --- variant 3: bf16 parameters + bf16 logits (HBM-traffic optimization) -
    mod3 = TPWordEmbedding(VOCAB, EMB, padding_idx=None, abs_pos=False,
                           reversible=True, tie_weights=True, bias=False,
                           world_size=1, key=k3, param_dtype=jnp.bfloat16)
    out3 = mod3.forward(inp)
    logits3 = mod3.forward(out3, reverse=True)
    jax.block_until_ready((out3, logits3))
    assert out3.dtype == jnp.bfloat16 and logits3.dtype == jnp.bfloat16
    ref3 = jnp.take(mod3.emb_full, inp, axis=0)
    assert jnp.allclose(out3.astype(jnp.float32), ref3.astype(jnp.float32),
                        atol=1e-6), "forward (bf16) mismatch"
    ref_logits3 = (out3.astype(jnp.float32)
                   @ mod3.head_wt[:EMB, :VOCAB].astype(jnp.float32))
    assert jnp.allclose(logits3.astype(jnp.float32), ref_logits3,
                        atol=2e-2, rtol=2e-2), "reverse (bf16) mismatch"

    print("KERNEL_OK")
</pallas_src>

<mosaic_0001>
module attributes {stable_mosaic.version = 11 : i64} {
  func.func @_embed_pos_kernel(%arg0: i32, %arg1: memref<16xi32, #tpu.memory_space<smem>>, %arg2: memref<16xi32, #tpu.memory_space<smem>>, %arg3: memref<8x1xf32, #tpu.memory_space<vmem>>, %arg4: memref<64x32xf32, #tpu.memory_space<any>>, %arg5: memref<16x32xf32, #tpu.memory_space<any>>, %arg6: memref<8x32xf32, #tpu.memory_space<vmem>>, %arg7: memref<8x32xf32, #tpu.memory_space<vmem>>, %arg8: memref<2x8x!tpu.dma_semaphore, #tpu.memory_space<semaphore_mem>>) attributes {dimension_semantics = [#tpu.dimension_semantics<parallel>], iteration_bounds = array<i64: 2>, scalar_prefetch = 2 : i64, scratch_operands = 2 : i64, tpu.core_type = #tpu.core_type<tc>, window_params = [{transform_indices = @transform_0, window_bounds = array<i64: 8, 1>}, {}, {}, {transform_indices = @transform_3, window_bounds = array<i64: 8, 32>}]} {
    %c8_i32 = arith.constant 8 : i32
    %0 = arith.muli %arg0, %c8_i32 : i32
    %c0_i32 = arith.constant 0 : i32
    %1 = arith.addi %0, %c0_i32 : i32
    %2 = arith.index_cast %1 : i32 to index
    %3 = memref.load %arg1[%2] : memref<16xi32, #tpu.memory_space<smem>>
    %c0_i32_0 = arith.constant 0 : i32
    %4 = arith.addi %0, %c0_i32_0 : i32
    %5 = arith.index_cast %4 : i32 to index
    %6 = memref.load %arg2[%5] : memref<16xi32, #tpu.memory_space<smem>>
    %c0_i32_1 = arith.constant 0 : i32
    %c0_i32_2 = arith.constant 0 : i32
    %c0_i32_3 = arith.constant 0 : i32
    %7 = tpu.memref_slice %arg4[%3, %c0_i32_3] : memref<64x32xf32, #tpu.memory_space<any>> -> memref<1x32xf32, #tpu.memory_space<any>>
    %c0_i32_4 = arith.constant 0 : i32
    %c0_i32_5 = arith.constant 0 : i32
    %8 = tpu.memref_slice %arg6[%c0_i32_4, %c0_i32_5] : memref<8x32xf32, #tpu.memory_space<vmem>> -> memref<1x32xf32, #tpu.memory_space<vmem>>
    %9 = tpu.memref_slice %arg8[%c0_i32_1, %c0_i32_2] : memref<2x8x!tpu.dma_semaphore, #tpu.memory_space<semaphore_mem>> -> memref<1x1x!tpu.dma_semaphore, #tpu.memory_space<semaphore_mem>>
    %10 = tpu.memref_squeeze %9 : memref<1x1x!tpu.dma_semaphore, #tpu.memory_space<semaphore_mem>> -> memref<!tpu.dma_semaphore, #tpu.memory_space<semaphore_mem>>
    tpu.enqueue_dma source(%7 : memref<1x32xf32, #tpu.memory_space<any>>) target(%8 : memref<1x32xf32, #tpu.memory_space<vmem>>) target_semaphore(%10 : memref<!tpu.dma_semaphore, #tpu.memory_space<semaphore_mem>>)
    %c1_i32 = arith.constant 1 : i32
    %c0_i32_6 = arith.constant 0 : i32
    %c0_i32_7 = arith.constant 0 : i32
    %11 = tpu.memref_slice %arg5[%6, %c0_i32_7] : memref<16x32xf32, #tpu.memory_space<any>> -> memref<1x32xf32, #tpu.memory_space<any>>
    %c0_i32_8 = arith.constant 0 : i32
    %c0_i32_9 = arith.constant 0 : i32
    %12 = tpu.memref_slice %arg7[%c0_i32_8, %c0_i32_9] : memref<8x32xf32, #tpu.memory_space<vmem>> -> memref<1x32xf32, #tpu.memory_space<vmem>>
    %13 = tpu.memref_slice %arg8[%c1_i32, %c0_i32_6] : memref<2x8x!tpu.dma_semaphore, #tpu.memory_space<semaphore_mem>> -> memref<1x1x!tpu.dma_semaphore, #tpu.memory_space<semaphore_mem>>
    %14 = tpu.memref_squeeze %13 : memref<1x1x!tpu.dma_semaphore, #tpu.memory_space<semaphore_mem>> -> memref<!tpu.dma_semaphore, #tpu.memory_space<semaphore_mem>>
    tpu.enqueue_dma source(%11 : memref<1x32xf32, #tpu.memory_space<any>>) target(%12 : memref<1x32xf32, #tpu.memory_space<vmem>>) target_semaphore(%14 : memref<!tpu.dma_semaphore, #tpu.memory_space<semaphore_mem>>)
    %c1_i32_10 = arith.constant 1 : i32
    %15 = arith.addi %0, %c1_i32_10 : i32
    %16 = arith.index_cast %15 : i32 to index
    %17 = memref.load %arg1[%16] : memref<16xi32, #tpu.memory_space<smem>>
    %c1_i32_11 = arith.constant 1 : i32
    %18 = arith.addi %0, %c1_i32_11 : i32
    %19 = arith.index_cast %18 : i32 to index
    %20 = memref.load %arg2[%19] : memref<16xi32, #tpu.memory_space<smem>>
    %c0_i32_12 = arith.constant 0 : i32
    %c1_i32_13 = arith.constant 1 : i32
    %c0_i32_14 = arith.constant 0 : i32
    %21 = tpu.memref_slice %arg4[%17, %c0_i32_14] : memref<64x32xf32, #tpu.memory_space<any>> -> memref<1x32xf32, #tpu.memory_space<any>>
    %c1_i32_15 = arith.constant 1 : i32
    %c0_i32_16 = arith.constant 0 : i32
    %22 = tpu.memref_slice %arg6[%c1_i32_15, %c0_i32_16] : memref<8x32xf32, #tpu.memory_space<vmem>> -> memref<1x32xf32, #tpu.memory_space<vmem>>
    %23 = tpu.memref_slice %arg8[%c0_i32_12, %c1_i32_13] : memref<2x8x!tpu.dma_semaphore, #tpu.memory_space<semaphore_mem>> -> memref<1x1x!tpu.dma_semaphore, #tpu.memory_space<semaphore_mem>>
    %24 = tpu.memref_squeeze %23 : memref<1x1x!tpu.dma_semaphore, #tpu.memory_space<semaphore_mem>> -> memref<!tpu.dma_semaphore, #tpu.memory_space<semaphore_mem>>
    tpu.enqueue_dma source(%21 : memref<1x32xf32, #tpu.memory_space<any>>) target(%22 : memref<1x32xf32, #tpu.memory_space<vmem>>) target_semaphore(%24 : memref<!tpu.dma_semaphore, #tpu.memory_space<semaphore_mem>>)
    %c1_i32_17 = arith.constant 1 : i32
    %c1_i32_18 = arith.constant 1 : i32
    %c0_i32_19 = arith.constant 0 : i32
    %25 = tpu.memref_slice %arg5[%20, %c0_i32_19] : memref<16x32xf32, #tpu.memory_space<any>> -> memref<1x32xf32, #tpu.memory_space<any>>
    %c1_i32_20 = arith.constant 1 : i32
    %c0_i32_21 = arith.constant 0 : i32
    %26 = tpu.memref_slice %arg7[%c1_i32_20, %c0_i32_21] : memref<8x32xf32, #tpu.memory_space<vmem>> -> memref<1x32xf32, #tpu.memory_space<vmem>>
    %27 = tpu.memref_slice %arg8[%c1_i32_17, %c1_i32_18] : memref<2x8x!tpu.dma_semaphore, #tpu.memory_space<semaphore_mem>> -> memref<1x1x!tpu.dma_semaphore, #tpu.memory_space<semaphore_mem>>
    %28 = tpu.memref_squeeze %27 : memref<1x1x!tpu.dma_semaphore, #tpu.memory_space<semaphore_mem>> -> memref<!tpu.dma_semaphore, #tpu.memory_space<semaphore_mem>>
    tpu.enqueue_dma source(%25 : memref<1x32xf32, #tpu.memory_space<any>>) target(%26 : memref<1x32xf32, #tpu.memory_space<vmem>>) target_semaphore(%28 : memref<!tpu.dma_semaphore, #tpu.memory_space<semaphore_mem>>)
    %c2_i32 = arith.constant 2 : i32
    %29 = arith.addi %0, %c2_i32 : i32
    %30 = arith.index_cast %29 : i32 to index
    %31 = memref.load %arg1[%30] : memref<16xi32, #tpu.memory_space<smem>>
    %c2_i32_22 = arith.constant 2 : i32
    %32 = arith.addi %0, %c2_i32_22 : i32
    %33 = arith.index_cast %32 : i32 to index
    %34 = memref.load %arg2[%33] : memref<16xi32, #tpu.memory_space<smem>>
    %c0_i32_23 = arith.constant 0 : i32
    %c2_i32_24 = arith.constant 2 : i32
    %c0_i32_25 = arith.constant 0 : i32
    %35 = tpu.memref_slice %arg4[%31, %c0_i32_25] : memref<64x32xf32, #tpu.memory_space<any>> -> memref<1x32xf32, #tpu.memory_space<any>>
    %c2_i32_26 = arith.constant 2 : i32
    %c0_i32_27 = arith.constant 0 : i32
    %36 = tpu.memref_slice %arg6[%c2_i32_26, %c0_i32_27] : memref<8x32xf32, #tpu.memory_space<vmem>> -> memref<1x32xf32, #tpu.memory_space<vmem>>
    %37 = tpu.memref_slice %arg8[%c0_i32_23, %c2_i32_24] : memref<2x8x!tpu.dma_semaphore, #tpu.memory_space<semaphore_mem>> -> memref<1x1x!tpu.dma_semaphore, #tpu.memory_space<semaphore_mem>>
    %38 = tpu.memref_squeeze %37 : memref<1x1x!tpu.dma_semaphore, #tpu.memory_space<semaphore_mem>> -> memref<!tpu.dma_semaphore, #tpu.memory_space<semaphore_mem>>
    tpu.enqueue_dma source(%35 : memref<1x32xf32, #tpu.memory_space<any>>) target(%36 : memref<1x32xf32, #tpu.memory_space<vmem>>) target_semaphore(%38 : memref<!tpu.dma_semaphore, #tpu.memory_space<semaphore_mem>>)
    %c1_i32_28 = arith.constant 1 : i32
    %c2_i32_29 = arith.constant 2 : i32
    %c0_i32_30 = arith.constant 0 : i32
    %39 = tpu.memref_slice %arg5[%34, %c0_i32_30] : memref<16x32xf32, #tpu.memory_space<any>> -> memref<1x32xf32, #tpu.memory_space<any>>
    %c2_i32_31 = arith.constant 2 : i32
    %c0_i32_32 = arith.constant 0 : i32
    %40 = tpu.memref_slice %arg7[%c2_i32_31, %c0_i32_32] : memref<8x32xf32, #tpu.memory_space<vmem>> -> memref<1x32xf32, #tpu.memory_space<vmem>>
    %41 = tpu.memref_slice %arg8[%c1_i32_28, %c2_i32_29] : memref<2x8x!tpu.dma_semaphore, #tpu.memory_space<semaphore_mem>> -> memref<1x1x!tpu.dma_semaphore, #tpu.memory_space<semaphore_mem>>
    %42 = tpu.memref_squeeze %41 : memref<1x1x!tpu.dma_semaphore, #tpu.memory_space<semaphore_mem>> -> memref<!tpu.dma_semaphore, #tpu.memory_space<semaphore_mem>>
    tpu.enqueue_dma source(%39 : memref<1x32xf32, #tpu.memory_space<any>>) target(%40 : memref<1x32xf32, #tpu.memory_space<vmem>>) target_semaphore(%42 : memref<!tpu.dma_semaphore, #tpu.memory_space<semaphore_mem>>)
    %c3_i32 = arith.constant 3 : i32
    %43 = arith.addi %0, %c3_i32 : i32
    %44 = arith.index_cast %43 : i32 to index
    %45 = memref.load %arg1[%44] : memref<16xi32, #tpu.memory_space<smem>>
    %c3_i32_33 = arith.constant 3 : i32
    %46 = arith.addi %0, %c3_i32_33 : i32
    %47 = arith.index_cast %46 : i32 to index
    %48 = memref.load %arg2[%47] : memref<16xi32, #tpu.memory_space<smem>>
    %c0_i32_34 = arith.constant 0 : i32
    %c3_i32_35 = arith.constant 3 : i32
    %c0_i32_36 = arith.constant 0 : i32
    %49 = tpu.memref_slice %arg4[%45, %c0_i32_36] : memref<64x32xf32, #tpu.memory_space<any>> -> memref<1x32xf32, #tpu.memory_space<any>>
    %c3_i32_37 = arith.constant 3 : i32
    %c0_i32_38 = arith.constant 0 : i32
    %50 = tpu.memref_slice %arg6[%c3_i32_37, %c0_i32_38] : memref<8x32xf32, #tpu.memory_space<vmem>> -> memref<1x32xf32, #tpu.memory_space<vmem>>
    %51 = tpu.memref_slice %arg8[%c0_i32_34, %c3_i32_35] : memref<2x8x!tpu.dma_semaphore, #tpu.memory_space<semaphore_mem>> -> memref<1x1x!tpu.dma_semaphore, #tpu.memory_space<semaphore_mem>>
    %52 = tpu.memref_squeeze %51 : memref<1x1x!tpu.dma_semaphore, #tpu.memory_space<semaphore_mem>> -> memref<!tpu.dma_semaphore, #tpu.memory_space<semaphore_mem>>
    tpu.enqueue_dma source(%49 : memref<1x32xf32, #tpu.memory_space<any>>) target(%50 : memref<1x32xf32, #tpu.memory_space<vmem>>) target_semaphore(%52 : memref<!tpu.dma_semaphore, #tpu.memory_space<semaphore_mem>>)
    %c1_i32_39 = arith.constant 1 : i32
    %c3_i32_40 = arith.constant 3 : i32
    %c0_i32_41 = arith.constant 0 : i32
    %53 = tpu.memref_slice %arg5[%48, %c0_i32_41] : memref<16x32xf32, #tpu.memory_space<any>> -> memref<1x32xf32, #tpu.memory_space<any>>
    %c3_i32_42 = arith.constant 3 : i32
    %c0_i32_43 = arith.constant 0 : i32
    %54 = tpu.memref_slice %arg7[%c3_i32_42, %c0_i32_43] : memref<8x32xf32, #tpu.memory_space<vmem>> -> memref<1x32xf32, #tpu.memory_space<vmem>>
    %55 = tpu.memref_slice %arg8[%c1_i32_39, %c3_i32_40] : memref<2x8x!tpu.dma_semaphore, #tpu.memory_space<semaphore_mem>> -> memref<1x1x!tpu.dma_semaphore, #tpu.memory_space<semaphore_mem>>
    %56 = tpu.memref_squeeze %55 : memref<1x1x!tpu.dma_semaphore, #tpu.memory_space<semaphore_mem>> -> memref<!tpu.dma_semaphore, #tpu.memory_space<semaphore_mem>>
    tpu.enqueue_dma source(%53 : memref<1x32xf32, #tpu.memory_space<any>>) target(%54 : memref<1x32xf32, #tpu.memory_space<vmem>>) target_semaphore(%56 : memref<!tpu.dma_semaphore, #tpu.memory_space<semaphore_mem>>)
    %c4_i32 = arith.constant 4 : i32
    %57 = arith.addi %0, %c4_i32 : i32
    %58 = arith.index_cast %57 : i32 to index
    %59 = memref.load %arg1[%58] : memref<16xi32, #tpu.memory_space<smem>>
    %c4_i32_44 = arith.constant 4 : i32
    %60 = arith.addi %0, %c4_i32_44 : i32
    %61 = arith.index_cast %60 : i32 to index
    %62 = memref.load %arg2[%61] : memref<16xi32, #tpu.memory_space<smem>>
    %c0_i32_45 = arith.constant 0 : i32
    %c4_i32_46 = arith.constant 4 : i32
    %c0_i32_47 = arith.constant 0 : i32
    %63 = tpu.memref_slice %arg4[%59, %c0_i32_47] : memref<64x32xf32, #tpu.memory_space<any>> -> memref<1x32xf32, #tpu.memory_space<any>>
    %c4_i32_48 = arith.constant 4 : i32
    %c0_i32_49 = arith.constant 0 : i32
    %64 = tpu.memref_slice %arg6[%c4_i32_48, %c0_i32_49] : memref<8x32xf32, #tpu.memory_space<vmem>> -> memref<1x32xf32, #tpu.memory_space<vmem>>
    %65 = tpu.memref_slice %arg8[%c0_i32_45, %c4_i32_46] : memref<2x8x!tpu.dma_semaphore, #tpu.memory_space<semaphore_mem>> -> memref<1x1x!tpu.dma_semaphore, #tpu.memory_space<semaphore_mem>>
    %66 = tpu.memref_squeeze %65 : memref<1x1x!tpu.dma_semaphore, #tpu.memory_space<semaphore_mem>> -> memref<!tpu.dma_semaphore, #tpu.memory_space<semaphore_mem>>
    tpu.enqueue_dma source(%63 : memref<1x32xf32, #tpu.memory_space<any>>) target(%64 : memref<1x32xf32, #tpu.memory_space<vmem>>) target_semaphore(%66 : memref<!tpu.dma_semaphore, #tpu.memory_space<semaphore_mem>>)
    %c1_i32_50 = arith.constant 1 : i32
    %c4_i32_51 = arith.constant 4 : i32
    %c0_i32_52 = arith.constant 0 : i32
    %67 = tpu.memref_slice %arg5[%62, %c0_i32_52] : memref<16x32xf32, #tpu.memory_space<any>> -> memref<1x32xf32, #tpu.memory_space<any>>
    %c4_i32_53 = arith.constant 4 : i32
    %c0_i32_54 = arith.constant 0 : i32
    %68 = tpu.memref_slice %arg7[%c4_i32_53, %c0_i32_54] : memref<8x32xf32, #tpu.memory_space<vmem>> -> memref<1x32xf32, #tpu.memory_space<vmem>>
    %69 = tpu.memref_slice %arg8[%c1_i32_50, %c4_i32_51] : memref<2x8x!tpu.dma_semaphore, #tpu.memory_space<semaphore_mem>> -> memref<1x1x!tpu.dma_semaphore, #tpu.memory_space<semaphore_mem>>
    %70 = tpu.memref_squeeze %69 : memref<1x1x!tpu.dma_semaphore, #tpu.memory_space<semaphore_mem>> -> memref<!tpu.dma_semaphore, #tpu.memory_space<semaphore_mem>>
    tpu.enqueue_dma source(%67 : memref<1x32xf32, #tpu.memory_space<any>>) target(%68 : memref<1x32xf32, #tpu.memory_space<vmem>>) target_semaphore(%70 : memref<!tpu.dma_semaphore, #tpu.memory_space<semaphore_mem>>)
    %c5_i32 = arith.constant 5 : i32
    %71 = arith.addi %0, %c5_i32 : i32
    %72 = arith.index_cast %71 : i32 to index
    %73 = memref.load %arg1[%72] : memref<16xi32, #tpu.memory_space<smem>>
    %c5_i32_55 = arith.constant 5 : i32
    %74 = arith.addi %0, %c5_i32_55 : i32
    %75 = arith.index_cast %74 : i32 to index
    %76 = memref.load %arg2[%75] : memref<16xi32, #tpu.memory_space<smem>>
    %c0_i32_56 = arith.constant 0 : i32
    %c5_i32_57 = arith.constant 5 : i32
    %c0_i32_58 = arith.constant 0 : i32
    %77 = tpu.memref_slice %arg4[%73, %c0_i32_58] : memref<64x32xf32, #tpu.memory_space<any>> -> memref<1x32xf32, #tpu.memory_space<any>>
    %c5_i32_59 = arith.constant 5 : i32
    %c0_i32_60 = arith.constant 0 : i32
    %78 = tpu.memref_slice %arg6[%c5_i32_59, %c0_i32_60] : memref<8x32xf32, #tpu.memory_space<vmem>> -> memref<1x32xf32, #tpu.memory_space<vmem>>
    %79 = tpu.memref_slice %arg8[%c0_i32_56, %c5_i32_57] : memref<2x8x!tpu.dma_semaphore, #tpu.memory_space<semaphore_mem>> -> memref<1x1x!tpu.dma_semaphore, #tpu.memory_space<semaphore_mem>>
    %80 = tpu.memref_squeeze %79 : memref<1x1x!tpu.dma_semaphore, #tpu.memory_space<semaphore_mem>> -> memref<!tpu.dma_semaphore, #tpu.memory_space<semaphore_mem>>
    tpu.enqueue_dma source(%77 : memref<1x32xf32, #tpu.memory_space<any>>) target(%78 : memref<1x32xf32, #tpu.memory_space<vmem>>) target_semaphore(%80 : memref<!tpu.dma_semaphore, #tpu.memory_space<semaphore_mem>>)
    %c1_i32_61 = arith.constant 1 : i32
    %c5_i32_62 = arith.constant 5 : i32
    %c0_i32_63 = arith.constant 0 : i32
    %81 = tpu.memref_slice %arg5[%76, %c0_i32_63] : memref<16x32xf32, #tpu.memory_space<any>> -> memref<1x32xf32, #tpu.memory_space<any>>
    %c5_i32_64 = arith.constant 5 : i32
    %c0_i32_65 = arith.constant 0 : i32
    %82 = tpu.memref_slice %arg7[%c5_i32_64, %c0_i32_65] : memref<8x32xf32, #tpu.memory_space<vmem>> -> memref<1x32xf32, #tpu.memory_space<vmem>>
    %83 = tpu.memref_slice %arg8[%c1_i32_61, %c5_i32_62] : memref<2x8x!tpu.dma_semaphore, #tpu.memory_space<semaphore_mem>> -> memref<1x1x!tpu.dma_semaphore, #tpu.memory_space<semaphore_mem>>
    %84 = tpu.memref_squeeze %83 : memref<1x1x!tpu.dma_semaphore, #tpu.memory_space<semaphore_mem>> -> memref<!tpu.dma_semaphore, #tpu.memory_space<semaphore_mem>>
    tpu.enqueue_dma source(%81 : memref<1x32xf32, #tpu.memory_space<any>>) target(%82 : memref<1x32xf32, #tpu.memory_space<vmem>>) target_semaphore(%84 : memref<!tpu.dma_semaphore, #tpu.memory_space<semaphore_mem>>)
    %c6_i32 = arith.constant 6 : i32
    %85 = arith.addi %0, %c6_i32 : i32
    %86 = arith.index_cast %85 : i32 to index
    %87 = memref.load %arg1[%86] : memref<16xi32, #tpu.memory_space<smem>>
    %c6_i32_66 = arith.constant 6 : i32
    %88 = arith.addi %0, %c6_i32_66 : i32
    %89 = arith.index_cast %88 : i32 to index
    %90 = memref.load %arg2[%89] : memref<16xi32, #tpu.memory_space<smem>>
    %c0_i32_67 = arith.constant 0 : i32
    %c6_i32_68 = arith.constant 6 : i32
    %c0_i32_69 = arith.constant 0 : i32
    %91 = tpu.memref_slice %arg4[%87, %c0_i32_69] : memref<64x32xf32, #tpu.memory_space<any>> -> memref<1x32xf32, #tpu.memory_space<any>>
    %c6_i32_70 = arith.constant 6 : i32
    %c0_i32_71 = arith.constant 0 : i32
    %92 = tpu.memref_slice %arg6[%c6_i32_70, %c0_i32_71] : memref<8x32xf32, #tpu.memory_space<vmem>> -> memref<1x32xf32, #tpu.memory_space<vmem>>
    %93 = tpu.memref_slice %arg8[%c0_i32_67, %c6_i32_68] : memref<2x8x!tpu.dma_semaphore, #tpu.memory_space<semaphore_mem>> -> memref<1x1x!tpu.dma_semaphore, #tpu.memory_space<semaphore_mem>>
    %94 = tpu.memref_squeeze %93 : memref<1x1x!tpu.dma_semaphore, #tpu.memory_space<semaphore_mem>> -> memref<!tpu.dma_semaphore, #tpu.memory_space<semaphore_mem>>
    tpu.enqueue_dma source(%91 : memref<1x32xf32, #tpu.memory_space<any>>) target(%92 : memref<1x32xf32, #tpu.memory_space<vmem>>) target_semaphore(%94 : memref<!tpu.dma_semaphore, #tpu.memory_space<semaphore_mem>>)
    %c1_i32_72 = arith.constant 1 : i32
    %c6_i32_73 = arith.constant 6 : i32
    %c0_i32_74 = arith.constant 0 : i32
    %95 = tpu.memref_slice %arg5[%90, %c0_i32_74] : memref<16x32xf32, #tpu.memory_space<any>> -> memref<1x32xf32, #tpu.memory_space<any>>
    %c6_i32_75 = arith.constant 6 : i32
    %c0_i32_76 = arith.constant 0 : i32
    %96 = tpu.memref_slice %arg7[%c6_i32_75, %c0_i32_76] : memref<8x32xf32, #tpu.memory_space<vmem>> -> memref<1x32xf32, #tpu.memory_space<vmem>>
    %97 = tpu.memref_slice %arg8[%c1_i32_72, %c6_i32_73] : memref<2x8x!tpu.dma_semaphore, #tpu.memory_space<semaphore_mem>> -> memref<1x1x!tpu.dma_semaphore, #tpu.memory_space<semaphore_mem>>
    %98 = tpu.memref_squeeze %97 : memref<1x1x!tpu.dma_semaphore, #tpu.memory_space<semaphore_mem>> -> memref<!tpu.dma_semaphore, #tpu.memory_space<semaphore_mem>>
    tpu.enqueue_dma source(%95 : memref<1x32xf32, #tpu.memory_space<any>>) target(%96 : memref<1x32xf32, #tpu.memory_space<vmem>>) target_semaphore(%98 : memref<!tpu.dma_semaphore, #tpu.memory_space<semaphore_mem>>)
    %c7_i32 = arith.constant 7 : i32
    %99 = arith.addi %0, %c7_i32 : i32
    %100 = arith.index_cast %99 : i32 to index
    %101 = memref.load %arg1[%100] : memref<16xi32, #tpu.memory_space<smem>>
    %c7_i32_77 = arith.constant 7 : i32
    %102 = arith.addi %0, %c7_i32_77 : i32
    %103 = arith.index_cast %102 : i32 to index
    %104 = memref.load %arg2[%103] : memref<16xi32, #tpu.memory_space<smem>>
    %c0_i32_78 = arith.constant 0 : i32
    %c7_i32_79 = arith.constant 7 : i32
    %c0_i32_80 = arith.constant 0 : i32
    %105 = tpu.memref_slice %arg4[%101, %c0_i32_80] : memref<64x32xf32, #tpu.memory_space<any>> -> memref<1x32xf32, #tpu.memory_space<any>>
    %c7_i32_81 = arith.constant 7 : i32
    %c0_i32_82 = arith.constant 0 : i32
    %106 = tpu.memref_slice %arg6[%c7_i32_81, %c0_i32_82] : memref<8x32xf32, #tpu.memory_space<vmem>> -> memref<1x32xf32, #tpu.memory_space<vmem>>
    %107 = tpu.memref_slice %arg8[%c0_i32_78, %c7_i32_79] : memref<2x8x!tpu.dma_semaphore, #tpu.memory_space<semaphore_mem>> -> memref<1x1x!tpu.dma_semaphore, #tpu.memory_space<semaphore_mem>>
    %108 = tpu.memref_squeeze %107 : memref<1x1x!tpu.dma_semaphore, #tpu.memory_space<semaphore_mem>> -> memref<!tpu.dma_semaphore, #tpu.memory_space<semaphore_mem>>
    tpu.enqueue_dma source(%105 : memref<1x32xf32, #tpu.memory_space<any>>) target(%106 : memref<1x32xf32, #tpu.memory_space<vmem>>) target_semaphore(%108 : memref<!tpu.dma_semaphore, #tpu.memory_space<semaphore_mem>>)
    %c1_i32_83 = arith.constant 1 : i32
    %c7_i32_84 = arith.constant 7 : i32
    %c0_i32_85 = arith.constant 0 : i32
    %109 = tpu.memref_slice %arg5[%104, %c0_i32_85] : memref<16x32xf32, #tpu.memory_space<any>> -> memref<1x32xf32, #tpu.memory_space<any>>
    %c7_i32_86 = arith.constant 7 : i32
    %c0_i32_87 = arith.constant 0 : i32
    %110 = tpu.memref_slice %arg7[%c7_i32_86, %c0_i32_87] : memref<8x32xf32, #tpu.memory_space<vmem>> -> memref<1x32xf32, #tpu.memory_space<vmem>>
    %111 = tpu.memref_slice %arg8[%c1_i32_83, %c7_i32_84] : memref<2x8x!tpu.dma_semaphore, #tpu.memory_space<semaphore_mem>> -> memref<1x1x!tpu.dma_semaphore, #tpu.memory_space<semaphore_mem>>
    %112 = tpu.memref_squeeze %111 : memref<1x1x!tpu.dma_semaphore, #tpu.memory_space<semaphore_mem>> -> memref<!tpu.dma_semaphore, #tpu.memory_space<semaphore_mem>>
    tpu.enqueue_dma source(%109 : memref<1x32xf32, #tpu.memory_space<any>>) target(%110 : memref<1x32xf32, #tpu.memory_space<vmem>>) target_semaphore(%112 : memref<!tpu.dma_semaphore, #tpu.memory_space<semaphore_mem>>)
    %c0_i32_88 = arith.constant 0 : i32
    %c0_i32_89 = arith.constant 0 : i32
    %c0_i32_90 = arith.constant 0 : i32
    %113 = tpu.memref_slice %arg4[%3, %c0_i32_90] : memref<64x32xf32, #tpu.memory_space<any>> -> memref<1x32xf32, #tpu.memory_space<any>>
    %c0_i32_91 = arith.constant 0 : i32
    %c0_i32_92 = arith.constant 0 : i32
    %114 = tpu.memref_slice %arg6[%c0_i32_91, %c0_i32_92] : memref<8x32xf32, #tpu.memory_space<vmem>> -> memref<1x32xf32, #tpu.memory_space<vmem>>
    %115 = tpu.memref_slice %arg8[%c0_i32_88, %c0_i32_89] : memref<2x8x!tpu.dma_semaphore, #tpu.memory_space<semaphore_mem>> -> memref<1x1x!tpu.dma_semaphore, #tpu.memory_space<semaphore_mem>>
    %116 = tpu.memref_squeeze %115 : memref<1x1x!tpu.dma_semaphore, #tpu.memory_space<semaphore_mem>> -> memref<!tpu.dma_semaphore, #tpu.memory_space<semaphore_mem>>
    tpu.wait_dma2 semaphore(%116 : memref<!tpu.dma_semaphore, #tpu.memory_space<semaphore_mem>>) src(%113 : memref<1x32xf32, #tpu.memory_space<any>>) dst(%114 : memref<1x32xf32, #tpu.memory_space<vmem>>)
    %c1_i32_93 = arith.constant 1 : i32
    %c0_i32_94 = arith.constant 0 : i32
    %c0_i32_95 = arith.constant 0 : i32
    %117 = tpu.memref_slice %arg5[%6, %c0_i32_95] : memref<16x32xf32, #tpu.memory_space<any>> -> memref<1x32xf32, #tpu.memory_space<any>>
    %c0_i32_96 = arith.constant 0 : i32
    %c0_i32_97 = arith.constant 0 : i32
    %118 = tpu.memref_slice %arg7[%c0_i32_96, %c0_i32_97] : memref<8x32xf32, #tpu.memory_space<vmem>> -> memref<1x32xf32, #tpu.memory_space<vmem>>
    %119 = tpu.memref_slice %arg8[%c1_i32_93, %c0_i32_94] : memref<2x8x!tpu.dma_semaphore, #tpu.memory_space<semaphore_mem>> -> memref<1x1x!tpu.dma_semaphore, #tpu.memory_space<semaphore_mem>>
    %120 = tpu.memref_squeeze %119 : memref<1x1x!tpu.dma_semaphore, #tpu.memory_space<semaphore_mem>> -> memref<!tpu.dma_semaphore, #tpu.memory_space<semaphore_mem>>
    tpu.wait_dma2 semaphore(%120 : memref<!tpu.dma_semaphore, #tpu.memory_space<semaphore_mem>>) src(%117 : memref<1x32xf32, #tpu.memory_space<any>>) dst(%118 : memref<1x32xf32, #tpu.memory_space<vmem>>)
    %c0_i32_98 = arith.constant 0 : i32
    %c1_i32_99 = arith.constant 1 : i32
    %c0_i32_100 = arith.constant 0 : i32
    %121 = tpu.memref_slice %arg4[%17, %c0_i32_100] : memref<64x32xf32, #tpu.memory_space<any>> -> memref<1x32xf32, #tpu.memory_space<any>>
    %c1_i32_101 = arith.constant 1 : i32
    %c0_i32_102 = arith.constant 0 : i32
    %122 = tpu.memref_slice %arg6[%c1_i32_101, %c0_i32_102] : memref<8x32xf32, #tpu.memory_space<vmem>> -> memref<1x32xf32, #tpu.memory_space<vmem>>
    %123 = tpu.memref_slice %arg8[%c0_i32_98, %c1_i32_99] : memref<2x8x!tpu.dma_semaphore, #tpu.memory_space<semaphore_mem>> -> memref<1x1x!tpu.dma_semaphore, #tpu.memory_space<semaphore_mem>>
    %124 = tpu.memref_squeeze %123 : memref<1x1x!tpu.dma_semaphore, #tpu.memory_space<semaphore_mem>> -> memref<!tpu.dma_semaphore, #tpu.memory_space<semaphore_mem>>
    tpu.wait_dma2 semaphore(%124 : memref<!tpu.dma_semaphore, #tpu.memory_space<semaphore_mem>>) src(%121 : memref<1x32xf32, #tpu.memory_space<any>>) dst(%122 : memref<1x32xf32, #tpu.memory_space<vmem>>)
    %c1_i32_103 = arith.constant 1 : i32
    %c1_i32_104 = arith.constant 1 : i32
    %c0_i32_105 = arith.constant 0 : i32
    %125 = tpu.memref_slice %arg5[%20, %c0_i32_105] : memref<16x32xf32, #tpu.memory_space<any>> -> memref<1x32xf32, #tpu.memory_space<any>>
    %c1_i32_106 = arith.constant 1 : i32
    %c0_i32_107 = arith.constant 0 : i32
    %126 = tpu.memref_slice %arg7[%c1_i32_106, %c0_i32_107] : memref<8x32xf32, #tpu.memory_space<vmem>> -> memref<1x32xf32, #tpu.memory_space<vmem>>
    %127 = tpu.memref_slice %arg8[%c1_i32_103, %c1_i32_104] : memref<2x8x!tpu.dma_semaphore, #tpu.memory_space<semaphore_mem>> -> memref<1x1x!tpu.dma_semaphore, #tpu.memory_space<semaphore_mem>>
    %128 = tpu.memref_squeeze %127 : memref<1x1x!tpu.dma_semaphore, #tpu.memory_space<semaphore_mem>> -> memref<!tpu.dma_semaphore, #tpu.memory_space<semaphore_mem>>
    tpu.wait_dma2 semaphore(%128 : memref<!tpu.dma_semaphore, #tpu.memory_space<semaphore_mem>>) src(%125 : memref<1x32xf32, #tpu.memory_space<any>>) dst(%126 : memref<1x32xf32, #tpu.memory_space<vmem>>)
    %c0_i32_108 = arith.constant 0 : i32
    %c2_i32_109 = arith.constant 2 : i32
    %c0_i32_110 = arith.constant 0 : i32
    %129 = tpu.memref_slice %arg4[%31, %c0_i32_110] : memref<64x32xf32, #tpu.memory_space<any>> -> memref<1x32xf32, #tpu.memory_space<any>>
    %c2_i32_111 = arith.constant 2 : i32
    %c0_i32_112 = arith.constant 0 : i32
    %130 = tpu.memref_slice %arg6[%c2_i32_111, %c0_i32_112] : memref<8x32xf32, #tpu.memory_space<vmem>> -> memref<1x32xf32, #tpu.memory_space<vmem>>
    %131 = tpu.memref_slice %arg8[%c0_i32_108, %c2_i32_109] : memref<2x8x!tpu.dma_semaphore, #tpu.memory_space<semaphore_mem>> -> memref<1x1x!tpu.dma_semaphore, #tpu.memory_space<semaphore_mem>>
    %132 = tpu.memref_squeeze %131 : memref<1x1x!tpu.dma_semaphore, #tpu.memory_space<semaphore_mem>> -> memref<!tpu.dma_semaphore, #tpu.memory_space<semaphore_mem>>
    tpu.wait_dma2 semaphore(%132 : memref<!tpu.dma_semaphore, #tpu.memory_space<semaphore_mem>>) src(%129 : memref<1x32xf32, #tpu.memory_space<any>>) dst(%130 : memref<1x32xf32, #tpu.memory_space<vmem>>)
    %c1_i32_113 = arith.constant 1 : i32
    %c2_i32_114 = arith.constant 2 : i32
    %c0_i32_115 = arith.constant 0 : i32
    %133 = tpu.memref_slice %arg5[%34, %c0_i32_115] : memref<16x32xf32, #tpu.memory_space<any>> -> memref<1x32xf32, #tpu.memory_space<any>>
    %c2_i32_116 = arith.constant 2 : i32
    %c0_i32_117 = arith.constant 0 : i32
    %134 = tpu.memref_slice %arg7[%c2_i32_116, %c0_i32_117] : memref<8x32xf32, #tpu.memory_space<vmem>> -> memref<1x32xf32, #tpu.memory_space<vmem>>
    %135 = tpu.memref_slice %arg8[%c1_i32_113, %c2_i32_114] : memref<2x8x!tpu.dma_semaphore, #tpu.memory_space<semaphore_mem>> -> memref<1x1x!tpu.dma_semaphore, #tpu.memory_space<semaphore_mem>>
    %136 = tpu.memref_squeeze %135 : memref<1x1x!tpu.dma_semaphore, #tpu.memory_space<semaphore_mem>> -> memref<!tpu.dma_semaphore, #tpu.memory_space<semaphore_mem>>
    tpu.wait_dma2 semaphore(%136 : memref<!tpu.dma_semaphore, #tpu.memory_space<semaphore_mem>>) src(%133 : memref<1x32xf32, #tpu.memory_space<any>>) dst(%134 : memref<1x32xf32, #tpu.memory_space<vmem>>)
    %c0_i32_118 = arith.constant 0 : i32
    %c3_i32_119 = arith.constant 3 : i32
    %c0_i32_120 = arith.constant 0 : i32
    %137 = tpu.memref_slice %arg4[%45, %c0_i32_120] : memref<64x32xf32, #tpu.memory_space<any>> -> memref<1x32xf32, #tpu.memory_space<any>>
    %c3_i32_121 = arith.constant 3 : i32
    %c0_i32_122 = arith.constant 0 : i32
    %138 = tpu.memref_slice %arg6[%c3_i32_121, %c0_i32_122] : memref<8x32xf32, #tpu.memory_space<vmem>> -> memref<1x32xf32, #tpu.memory_space<vmem>>
    %139 = tpu.memref_slice %arg8[%c0_i32_118, %c3_i32_119] : memref<2x8x!tpu.dma_semaphore, #tpu.memory_space<semaphore_mem>> -> memref<1x1x!tpu.dma_semaphore, #tpu.memory_space<semaphore_mem>>
    %140 = tpu.memref_squeeze %139 : memref<1x1x!tpu.dma_semaphore, #tpu.memory_space<semaphore_mem>> -> memref<!tpu.dma_semaphore, #tpu.memory_space<semaphore_mem>>
    tpu.wait_dma2 semaphore(%140 : memref<!tpu.dma_semaphore, #tpu.memory_space<semaphore_mem>>) src(%137 : memref<1x32xf32, #tpu.memory_space<any>>) dst(%138 : memref<1x32xf32, #tpu.memory_space<vmem>>)
    %c1_i32_123 = arith.constant 1 : i32
    %c3_i32_124 = arith.constant 3 : i32
    %c0_i32_125 = arith.constant 0 : i32
    %141 = tpu.memref_slice %arg5[%48, %c0_i32_125] : memref<16x32xf32, #tpu.memory_space<any>> -> memref<1x32xf32, #tpu.memory_space<any>>
    %c3_i32_126 = arith.constant 3 : i32
    %c0_i32_127 = arith.constant 0 : i32
    %142 = tpu.memref_slice %arg7[%c3_i32_126, %c0_i32_127] : memref<8x32xf32, #tpu.memory_space<vmem>> -> memref<1x32xf32, #tpu.memory_space<vmem>>
    %143 = tpu.memref_slice %arg8[%c1_i32_123, %c3_i32_124] : memref<2x8x!tpu.dma_semaphore, #tpu.memory_space<semaphore_mem>> -> memref<1x1x!tpu.dma_semaphore, #tpu.memory_space<semaphore_mem>>
    %144 = tpu.memref_squeeze %143 : memref<1x1x!tpu.dma_semaphore, #tpu.memory_space<semaphore_mem>> -> memref<!tpu.dma_semaphore, #tpu.memory_space<semaphore_mem>>
    tpu.wait_dma2 semaphore(%144 : memref<!tpu.dma_semaphore, #tpu.memory_space<semaphore_mem>>) src(%141 : memref<1x32xf32, #tpu.memory_space<any>>) dst(%142 : memref<1x32xf32, #tpu.memory_space<vmem>>)
    %c0_i32_128 = arith.constant 0 : i32
    %c4_i32_129 = arith.constant 4 : i32
    %c0_i32_130 = arith.constant 0 : i32
    %145 = tpu.memref_slice %arg4[%59, %c0_i32_130] : memref<64x32xf32, #tpu.memory_space<any>> -> memref<1x32xf32, #tpu.memory_space<any>>
    %c4_i32_131 = arith.constant 4 : i32
    %c0_i32_132 = arith.constant 0 : i32
    %146 = tpu.memref_slice %arg6[%c4_i32_131, %c0_i32_132] : memref<8x32xf32, #tpu.memory_space<vmem>> -> memref<1x32xf32, #tpu.memory_space<vmem>>
    %147 = tpu.memref_slice %arg8[%c0_i32_128, %c4_i32_129] : memref<2x8x!tpu.dma_semaphore, #tpu.memory_space<semaphore_mem>> -> memref<1x1x!tpu.dma_semaphore, #tpu.memory_space<semaphore_mem>>
    %148 = tpu.memref_squeeze %147 : memref<1x1x!tpu.dma_semaphore, #tpu.memory_space<semaphore_mem>> -> memref<!tpu.dma_semaphore, #tpu.memory_space<semaphore_mem>>
    tpu.wait_dma2 semaphore(%148 : memref<!tpu.dma_semaphore, #tpu.memory_space<semaphore_mem>>) src(%145 : memref<1x32xf32, #tpu.memory_space<any>>) dst(%146 : memref<1x32xf32, #tpu.memory_space<vmem>>)
    %c1_i32_133 = arith.constant 1 : i32
    %c4_i32_134 = arith.constant 4 : i32
    %c0_i32_135 = arith.constant 0 : i32
    %149 = tpu.memref_slice %arg5[%62, %c0_i32_135] : memref<16x32xf32, #tpu.memory_space<any>> -> memref<1x32xf32, #tpu.memory_space<any>>
    %c4_i32_136 = arith.constant 4 : i32
    %c0_i32_137 = arith.constant 0 : i32
    %150 = tpu.memref_slice %arg7[%c4_i32_136, %c0_i32_137] : memref<8x32xf32, #tpu.memory_space<vmem>> -> memref<1x32xf32, #tpu.memory_space<vmem>>
    %151 = tpu.memref_slice %arg8[%c1_i32_133, %c4_i32_134] : memref<2x8x!tpu.dma_semaphore, #tpu.memory_space<semaphore_mem>> -> memref<1x1x!tpu.dma_semaphore, #tpu.memory_space<semaphore_mem>>
    %152 = tpu.memref_squeeze %151 : memref<1x1x!tpu.dma_semaphore, #tpu.memory_space<semaphore_mem>> -> memref<!tpu.dma_semaphore, #tpu.memory_space<semaphore_mem>>
    tpu.wait_dma2 semaphore(%152 : memref<!tpu.dma_semaphore, #tpu.memory_space<semaphore_mem>>) src(%149 : memref<1x32xf32, #tpu.memory_space<any>>) dst(%150 : memref<1x32xf32, #tpu.memory_space<vmem>>)
    %c0_i32_138 = arith.constant 0 : i32
    %c5_i32_139 = arith.constant 5 : i32
    %c0_i32_140 = arith.constant 0 : i32
    %153 = tpu.memref_slice %arg4[%73, %c0_i32_140] : memref<64x32xf32, #tpu.memory_space<any>> -> memref<1x32xf32, #tpu.memory_space<any>>
    %c5_i32_141 = arith.constant 5 : i32
    %c0_i32_142 = arith.constant 0 : i32
    %154 = tpu.memref_slice %arg6[%c5_i32_141, %c0_i32_142] : memref<8x32xf32, #tpu.memory_space<vmem>> -> memref<1x32xf32, #tpu.memory_space<vmem>>
    %155 = tpu.memref_slice %arg8[%c0_i32_138, %c5_i32_139] : memref<2x8x!tpu.dma_semaphore, #tpu.memory_space<semaphore_mem>> -> memref<1x1x!tpu.dma_semaphore, #tpu.memory_space<semaphore_mem>>
    %156 = tpu.memref_squeeze %155 : memref<1x1x!tpu.dma_semaphore, #tpu.memory_space<semaphore_mem>> -> memref<!tpu.dma_semaphore, #tpu.memory_space<semaphore_mem>>
    tpu.wait_dma2 semaphore(%156 : memref<!tpu.dma_semaphore, #tpu.memory_space<semaphore_mem>>) src(%153 : memref<1x32xf32, #tpu.memory_space<any>>) dst(%154 : memref<1x32xf32, #tpu.memory_space<vmem>>)
    %c1_i32_143 = arith.constant 1 : i32
    %c5_i32_144 = arith.constant 5 : i32
    %c0_i32_145 = arith.constant 0 : i32
    %157 = tpu.memref_slice %arg5[%76, %c0_i32_145] : memref<16x32xf32, #tpu.memory_space<any>> -> memref<1x32xf32, #tpu.memory_space<any>>
    %c5_i32_146 = arith.constant 5 : i32
    %c0_i32_147 = arith.constant 0 : i32
    %158 = tpu.memref_slice %arg7[%c5_i32_146, %c0_i32_147] : memref<8x32xf32, #tpu.memory_space<vmem>> -> memref<1x32xf32, #tpu.memory_space<vmem>>
    %159 = tpu.memref_slice %arg8[%c1_i32_143, %c5_i32_144] : memref<2x8x!tpu.dma_semaphore, #tpu.memory_space<semaphore_mem>> -> memref<1x1x!tpu.dma_semaphore, #tpu.memory_space<semaphore_mem>>
    %160 = tpu.memref_squeeze %159 : memref<1x1x!tpu.dma_semaphore, #tpu.memory_space<semaphore_mem>> -> memref<!tpu.dma_semaphore, #tpu.memory_space<semaphore_mem>>
    tpu.wait_dma2 semaphore(%160 : memref<!tpu.dma_semaphore, #tpu.memory_space<semaphore_mem>>) src(%157 : memref<1x32xf32, #tpu.memory_space<any>>) dst(%158 : memref<1x32xf32, #tpu.memory_space<vmem>>)
    %c0_i32_148 = arith.constant 0 : i32
    %c6_i32_149 = arith.constant 6 : i32
    %c0_i32_150 = arith.constant 0 : i32
    %161 = tpu.memref_slice %arg4[%87, %c0_i32_150] : memref<64x32xf32, #tpu.memory_space<any>> -> memref<1x32xf32, #tpu.memory_space<any>>
    %c6_i32_151 = arith.constant 6 : i32
    %c0_i32_152 = arith.constant 0 : i32
    %162 = tpu.memref_slice %arg6[%c6_i32_151, %c0_i32_152] : memref<8x32xf32, #tpu.memory_space<vmem>> -> memref<1x32xf32, #tpu.memory_space<vmem>>
    %163 = tpu.memref_slice %arg8[%c0_i32_148, %c6_i32_149] : memref<2x8x!tpu.dma_semaphore, #tpu.memory_space<semaphore_mem>> -> memref<1x1x!tpu.dma_semaphore, #tpu.memory_space<semaphore_mem>>
    %164 = tpu.memref_squeeze %163 : memref<1x1x!tpu.dma_semaphore, #tpu.memory_space<semaphore_mem>> -> memref<!tpu.dma_semaphore, #tpu.memory_space<semaphore_mem>>
    tpu.wait_dma2 semaphore(%164 : memref<!tpu.dma_semaphore, #tpu.memory_space<semaphore_mem>>) src(%161 : memref<1x32xf32, #tpu.memory_space<any>>) dst(%162 : memref<1x32xf32, #tpu.memory_space<vmem>>)
    %c1_i32_153 = arith.constant 1 : i32
    %c6_i32_154 = arith.constant 6 : i32
    %c0_i32_155 = arith.constant 0 : i32
    %165 = tpu.memref_slice %arg5[%90, %c0_i32_155] : memref<16x32xf32, #tpu.memory_space<any>> -> memref<1x32xf32, #tpu.memory_space<any>>
    %c6_i32_156 = arith.constant 6 : i32
    %c0_i32_157 = arith.constant 0 : i32
    %166 = tpu.memref_slice %arg7[%c6_i32_156, %c0_i32_157] : memref<8x32xf32, #tpu.memory_space<vmem>> -> memref<1x32xf32, #tpu.memory_space<vmem>>
    %167 = tpu.memref_slice %arg8[%c1_i32_153, %c6_i32_154] : memref<2x8x!tpu.dma_semaphore, #tpu.memory_space<semaphore_mem>> -> memref<1x1x!tpu.dma_semaphore, #tpu.memory_space<semaphore_mem>>
    %168 = tpu.memref_squeeze %167 : memref<1x1x!tpu.dma_semaphore, #tpu.memory_space<semaphore_mem>> -> memref<!tpu.dma_semaphore, #tpu.memory_space<semaphore_mem>>
    tpu.wait_dma2 semaphore(%168 : memref<!tpu.dma_semaphore, #tpu.memory_space<semaphore_mem>>) src(%165 : memref<1x32xf32, #tpu.memory_space<any>>) dst(%166 : memref<1x32xf32, #tpu.memory_space<vmem>>)
    %c0_i32_158 = arith.constant 0 : i32
    %c7_i32_159 = arith.constant 7 : i32
    %c0_i32_160 = arith.constant 0 : i32
    %169 = tpu.memref_slice %arg4[%101, %c0_i32_160] : memref<64x32xf32, #tpu.memory_space<any>> -> memref<1x32xf32, #tpu.memory_space<any>>
    %c7_i32_161 = arith.constant 7 : i32
    %c0_i32_162 = arith.constant 0 : i32
    %170 = tpu.memref_slice %arg6[%c7_i32_161, %c0_i32_162] : memref<8x32xf32, #tpu.memory_space<vmem>> -> memref<1x32xf32, #tpu.memory_space<vmem>>
    %171 = tpu.memref_slice %arg8[%c0_i32_158, %c7_i32_159] : memref<2x8x!tpu.dma_semaphore, #tpu.memory_space<semaphore_mem>> -> memref<1x1x!tpu.dma_semaphore, #tpu.memory_space<semaphore_mem>>
    %172 = tpu.memref_squeeze %171 : memref<1x1x!tpu.dma_semaphore, #tpu.memory_space<semaphore_mem>> -> memref<!tpu.dma_semaphore, #tpu.memory_space<semaphore_mem>>
    tpu.wait_dma2 semaphore(%172 : memref<!tpu.dma_semaphore, #tpu.memory_space<semaphore_mem>>) src(%169 : memref<1x32xf32, #tpu.memory_space<any>>) dst(%170 : memref<1x32xf32, #tpu.memory_space<vmem>>)
    %c1_i32_163 = arith.constant 1 : i32
    %c7_i32_164 = arith.constant 7 : i32
    %c0_i32_165 = arith.constant 0 : i32
    %173 = tpu.memref_slice %arg5[%104, %c0_i32_165] : memref<16x32xf32, #tpu.memory_space<any>> -> memref<1x32xf32, #tpu.memory_space<any>>
    %c7_i32_166 = arith.constant 7 : i32
    %c0_i32_167 = arith.constant 0 : i32
    %174 = tpu.memref_slice %arg7[%c7_i32_166, %c0_i32_167] : memref<8x32xf32, #tpu.memory_space<vmem>> -> memref<1x32xf32, #tpu.memory_space<vmem>>
    %175 = tpu.memref_slice %arg8[%c1_i32_163, %c7_i32_164] : memref<2x8x!tpu.dma_semaphore, #tpu.memory_space<semaphore_mem>> -> memref<1x1x!tpu.dma_semaphore, #tpu.memory_space<semaphore_mem>>
    %176 = tpu.memref_squeeze %175 : memref<1x1x!tpu.dma_semaphore, #tpu.memory_space<semaphore_mem>> -> memref<!tpu.dma_semaphore, #tpu.memory_space<semaphore_mem>>
    tpu.wait_dma2 semaphore(%176 : memref<!tpu.dma_semaphore, #tpu.memory_space<semaphore_mem>>) src(%173 : memref<1x32xf32, #tpu.memory_space<any>>) dst(%174 : memref<1x32xf32, #tpu.memory_space<vmem>>)
    %c0 = arith.constant 0 : index
    %c0_168 = arith.constant 0 : index
    %177 = vector.load %arg6[%c0, %c0_168] : memref<8x32xf32, #tpu.memory_space<vmem>>, vector<8x32xf32>
    %c0_169 = arith.constant 0 : index
    %c0_170 = arith.constant 0 : index
    %178 = vector.load %arg7[%c0_169, %c0_170] : memref<8x32xf32, #tpu.memory_space<vmem>>, vector<8x32xf32>
    %c0_171 = arith.constant 0 : index
    %c0_172 = arith.constant 0 : index
    %179 = vector.load %arg3[%c0_171, %c0_172] : memref<8x1xf32, #tpu.memory_space<vmem>>, vector<8x1xf32>
    %180 = vector.broadcast %179 : vector<8x1xf32> to vector<8x32xf32>
    %181 = arith.mulf %178, %180 : vector<8x32xf32>
    %182 = arith.addf %177, %181 : vector<8x32xf32>
    %c0_173 = arith.constant 0 : index
    %c0_174 = arith.constant 0 : index
    %183 = vector.load %arg6[%c0_173, %c0_174] : memref<8x32xf32, #tpu.memory_space<vmem>>, vector<8x32xf32>
    tpu.vector_store %arg6[%c0_173, %c0_174], %182 {strides = array<i32>} : memref<8x32xf32, #tpu.memory_space<vmem>>, vector<8x32xf32>,
    return
  }
  func.func @transform_0(%arg0: i32, %arg1: memref<16xi32, #tpu.memory_space<smem>>, %arg2: memref<16xi32, #tpu.memory_space<smem>>) -> (i32, i32) {
    %c0_i32 = arith.constant 0 : i32
    %c0_i32_0 = arith.constant 0 : i32
    return %arg0, %c0_i32 : i32, i32
  }
  func.func @transform_3(%arg0: i32, %arg1: memref<16xi32, #tpu.memory_space<smem>>, %arg2: memref<16xi32, #tpu.memory_space<smem>>) -> (i32, i32) {
    %c0_i32 = arith.constant 0 : i32
    %c0_i32_0 = arith.constant 0 : i32
    return %arg0, %c0_i32 : i32, i32
  }
}

</mosaic_0001>

<bundles_post_ra>
// kernel: tpu_custom_call.1
= control target key start
LH: loop header
LB: loop body
LE: loop exit
PB: predicated region body
PF: predicated region fallthrough
CT: control target
= control target key end

     0   :  { %s1744_s0 = inlined_call_operand.vmem [shape: s32[16], index: 0, kind: input, shape index: {}]   ;;  %s1745_s2 = inlined_call_operand.vmem [shape: f32[16,1], index: 2, kind: input, shape index: {}]   ;;  %s1746_s3 = inlined_call_operand.vmem [shape: f32[64,32], index: 3, kind: input, shape index: {}]   ;;  %s1747_s4 = inlined_call_operand.vmem [shape: f32[16,32], index: 4, kind: input, shape index: {}]   ;;  %s1748_s5 = inlined_call_operand.hbm [shape: f32[16,32], index: 5, kind: output, shape index: {}]   ;;  %s1749_s1 = inlined_call_operand.vmem [shape: s32[16], index: 1, kind: input, shape index: {}]  }
   0x1   :  { %s10_s20 = sshll.u32 %s1744_s0, 4  ;;  %s14_s23 = sshll.u32 %s1749_s1, 4  ;;  %s11_s20 = int_to_ptr.vmem [resolvable:$true] %s10_s20  ;;  %s15_s23 = int_to_ptr.vmem [resolvable:$true] %s14_s23 }
   0x2   :  { %s1402_s24 = scalar_lea.vmem %s11_s20, 16  ;;  %p1407_p1 = scmp.lt.s32.totalorder %s11_s20, %s11_s20 }
   0x3   :  { %p1403_p0 = scmp.ne.s32.totalorder %s11_s20, %s1402_s24  ;;  %p1408_p2 = scmp.lt.s32.totalorder %s1402_s24, %s1402_s24 }
   0x5   :  { %p1409_p3 = por %p1408_p2, %p1407_p1 }
   0x7   :  { %p1410_p4 = pnand %p1409_p3, %p1403_p0 }
   0x9   :  { %1413 = shalt.err (!%p1410_p4)  }
   0xa   :  { %s1524_s25 = smov [#allocation5]   ;;  %s1414_s26 = scalar_lea.vmem %s15_s23, 16 }
   0xb   :  { %13 = dma.vmem_to_smem %s11_s20, 16, %s1524_s25, [#allocation4] }
   0xc   :  { %p1415_p5 = scmp.ne.s32.totalorder %s15_s23, %s1414_s26  ;;  %p1419_p6 = scmp.lt.s32.totalorder %s15_s23, %s15_s23 }
   0xd   :  { %p1420_p7 = scmp.lt.s32.totalorder %s1414_s26, %s1414_s26 }
   0xf   :  { %p1421_p8 = por %p1420_p7, %p1419_p6 }
  0x11   :  { %p1422_p9 = pnand %p1421_p8, %p1415_p5 }
  0x13   :  { %1425 = shalt.err (!%p1422_p9)  }
  0x14   :  { %s1525_s0 = smov [#allocation6]  }
  0x15   :  { %17 = dma.vmem_to_smem %s15_s23, 16, %s1525_s0, [#allocation4] }
  0x16   :  { %1470 = dma.done.wait [#allocation4], 32 }
  0x17   :  { %1471 = vsyncadd [#allocation4], 4294967264 }
  0x18   :  { %19 = sfence }
  0x19   :  { %20 = vsyncpa [#allocation8], 0 }
  0x1a   :  { %22 = vsyncpa [#allocation8 + $0x1], 0  ;;  %s1564_s1 = smov 0   ;;  %s1566_s27 = smov 0  }
  0x1b   :  { %s1568_s28 = smov 0   ;;  %s1570_s29 = smov 0  }
  0x1c LB: > { %s1585_s30 = sadd.s32 4294967295, %s1522_s29   ;;  %s1318_s6 = sadd.s32 4294967294, %s1522_s29   ;;  %s1522_s29 = sphi %s1570_s29, %s1755_s29   ;;  %s1518_s28 = sphi %s1568_s28, %s1754_s28   ;;  %s1514_s27 = sphi %s1566_s27, %s1753_s27   ;;  %s1510_s1 = sphi %s1564_s1, %s1752_s1  }
  0x1d   : > { %s1589_s7 = sadd.s32 1, %s1522_s29   ;;  %s61_s8 = sadd.s32 1, %s1518_s28 }
  0x1e   : > { %s58_s9 = ssub.s32 %s1522_s29, %s1589_s7  ;;  %p71_p10 = scmp.ne.s32.totalorder %s1518_s28, %s1514_s27 }
  0x1f   : > { %p59_p11 = scmp.eq.s32.totalorder %s58_s9, 0  ;;  %p72_p12 = scmp.eq.s32.totalorder %s1585_s30, 1 }
  0x20   : > { %p77_p13 = scmp.ne.s32.totalorder %s1514_s27, %s1510_s1  ;;  %p78_p0 = scmp.eq.s32.totalorder %s1318_s6, 1 }
  0x21   : > { %s1600_s10 = scalar_select %p59_p11, %s1518_s28, %s61_s8  }
  0x22   : > { %p1602_p1 = por %p72_p12, %p71_p10  ;;  %p1606_p2 = por %p78_p0, %p77_p13 }
  0x23   : > { %p1321_p3 = scmp.ge.s32.totalorder %s1522_s29, 1  ;;  %p103_p4 = scmp.lt.s32.totalorder %s1522_s29, 3 }
  0x25   : > { %p104_p5 = pnand %p1321_p3, %p103_p4 }
  0x26   : > { %p122_p6 = scmp.lt.s32.totalorder (!%p104_p5), %s1585_s30, 1  ;;  %s119_s13 = sand.u32 (!%p104_p5), 1, %s1514_s27  }
  0x27   : > { %107 = sbr.rel (%p104_p5) target bundleno = 324 (0x144), region = 24  ;;  %s1615_s14 = sshll.u32 (!%p104_p5), %s1585_s30, 3 }
  0x28   : > { %s127_s15 = sld [smem:[#allocation5 + %s1615_s14]] (!%p104_p5)  ;;  %s1322_s17 = sshll.u32 (!%p104_p5), %s119_s13, 3 }
  0x29   : > { %s128_s18 = sld [smem:[#allocation6 + %s1615_s14]] (!%p104_p5)  ;;  %s1630_s26 = scalar_lea.vmem (!%p104_p5), [#allocation7], %s1322_s17 }
  0x2e   : > { %s123_s16 = scalar_select %p122_p6, %s1585_s30, 1 }
  0x2f   : > { %s129_s25 = scalar_lea.vmem %s1746_s3, %s127_s15 }
  0x30   : > { %s1323_s19 = sshll.u32 %s123_s16, 3  ;;  %v147_v0 = vld [vmem:[%s129_s25] sm:$0x1] }
  0x31   : > { %s1625_s22 = scalar_lea.vmem %s1745_s2, %s1323_s19  ;;  %148 = vst [vmem:[%s1630_s26] sm:$0x1] %v147_v0 }
  0x32   : > { %173 = vsyncadd [#allocation3], 16  ;;  %s174_s8 = scalar_lea.vmem %s1747_s4, %s128_s18 }
  0x33   : > { %v193_v1 = vld [vmem:[%s174_s8] sm:$0x1] }
  0x34   : > { %194 = vst [vmem:[#allocation2] sm:$0x1] %v193_v1 }
  0x35   : > { %219 = vsyncadd [#allocation3 + $0x8], 16  ;;  %s220_s9 = sadd.s32 1, %s1615_s14 }
  0x36   : > { %s221_s16 = sld [smem:[#allocation5 + %s220_s9]] }
  0x37   : > { %s222_s19 = sld [smem:[#allocation6 + %s220_s9]] }
  0x3c   : > { %s223_s17 = scalar_lea.vmem %s1746_s3, %s221_s16 }
  0x3d   : > { %v243_v2 = vld [vmem:[%s223_s17] sm:$0x1] }
  0x3e   : > { %1326 = vst [vmem:[%s1630_s26 + $0x1] sm:$0x1] %v243_v2 }
  0x3f   : > { %269 = vsyncadd [#allocation3 + $0x1], 16  ;;  %s270_s24 = scalar_lea.vmem %s1747_s4, %s222_s19 }
  0x40   : > { %v290_v3 = vld [vmem:[%s270_s24] sm:$0x1] }
  0x41   : > { %291 = vst [vmem:[#allocation2 + $0x1] sm:$0x1] %v290_v3 }
  0x42   : > { %316 = vsyncadd [#allocation3 + $0x9], 16  ;;  %s317_s18 = sadd.s32 2, %s1615_s14 }
  0x43   : > { %s318_s25 = sld [smem:[#allocation5 + %s317_s18]] }
  0x44   : > { %s319_s0 = sld [smem:[#allocation6 + %s317_s18]] }
  0x49   : > { %s320_s9 = scalar_lea.vmem %s1746_s3, %s318_s25 }
  0x4a   : > { %v340_v4 = vld [vmem:[%s320_s9] sm:$0x1] }
  0x4b   : > { %1328 = vst [vmem:[%s1630_s26 + $0x2] sm:$0x1] %v340_v4 }
  0x4c   : > { %366 = vsyncadd [#allocation3 + $0x2], 16  ;;  %s367_s15 = scalar_lea.vmem %s1747_s4, %s319_s0 }
  0x4d   : > { %v387_v5 = vld [vmem:[%s367_s15] sm:$0x1] }
  0x4e   : > { %388 = vst [vmem:[#allocation2 + $0x2] sm:$0x1] %v387_v5 }
  0x4f   : > { %413 = vsyncadd [#allocation3 + $0xa], 16  ;;  %s414_s19 = sadd.s32 3, %s1615_s14 }
  0x50   : > { %s415_s17 = sld [smem:[#allocation5 + %s414_s19]] }
  0x51   : > { %s416_s21 = sld [smem:[#allocation6 + %s414_s19]] }
  0x56   : > { %s417_s18 = scalar_lea.vmem %s1746_s3, %s415_s17 }
  0x57   : > { %v437_v6 = vld [vmem:[%s417_s18] sm:$0x1] }
  0x58   : > { %1330 = vst [vmem:[%s1630_s26 + $0x3] sm:$0x1] %v437_v6 }
  0x59   : > { %463 = vsyncadd [#allocation3 + $0x3], 16  ;;  %s464_s8 = scalar_lea.vmem %s1747_s4, %s416_s21 }
  0x5a   : > { %v484_v7 = vld [vmem:[%s464_s8] sm:$0x1] }
  0x5b   : > { %485 = vst [vmem:[#allocation2 + $0x3] sm:$0x1] %v484_v7 }
  0x5c   : > { %510 = vsyncadd [#allocation3 + $0xb], 16  ;;  %s511_s0 = sadd.s32 4, %s1615_s14 }
  0x5d   : > { %s512_s9 = sld [smem:[#allocation5 + %s511_s0]] }
  0x5e   : > { %s513_s16 = sld [smem:[#allocation6 + %s511_s0]] }
  0x63   : > { %s514_s19 = scalar_lea.vmem %s1746_s3, %s512_s9 }
  0x64   : > { %v534_v8 = vld [vmem:[%s514_s19] sm:$0x1] }
  0x65   : > { %1332 = vst [vmem:[%s1630_s26 + $0x4] sm:$0x1] %v534_v8 }
  0x66   : > { %560 = vsyncadd [#allocation3 + $0x4], 16  ;;  %s561_s24 = scalar_lea.vmem %s1747_s4, %s513_s16 }
  0x67   : > { %v581_v9 = vld [vmem:[%s561_s24] sm:$0x1] }
  0x68   : > { %582 = vst [vmem:[#allocation2 + $0x4] sm:$0x1] %v581_v9 }
  0x69   : > { %607 = vsyncadd [#allocation3 + $0xc], 16  ;;  %s608_s21 = sadd.s32 5, %s1615_s14 }
  0x6a   : > { %s609_s18 = sld [smem:[#allocation5 + %s608_s21]] }
  0x6b   : > { %s610_s25 = sld [smem:[#allocation6 + %s608_s21]] }
  0x70   : > { %s611_s0 = scalar_lea.vmem %s1746_s3, %s609_s18 }
  0x71   : > { %v631_v10 = vld [vmem:[%s611_s0] sm:$0x1] }
  0x72   : > { %1334 = vst [vmem:[%s1630_s26 + $0x5] sm:$0x1] %v631_v10 }
  0x73   : > { %657 = vsyncadd [#allocation3 + $0x5], 16  ;;  %s658_s15 = scalar_lea.vmem %s1747_s4, %s610_s25 }
  0x74   : > { %v678_v11 = vld [vmem:[%s658_s15] sm:$0x1] }
  0x75   : > { %679 = vst [vmem:[#allocation2 + $0x5] sm:$0x1] %v678_v11 }
  0x76   : > { %704 = vsyncadd [#allocation3 + $0xd], 16  ;;  %s705_s16 = sadd.s32 6, %s1615_s14 }
  0x77   : > { %s706_s19 = sld [smem:[#allocation5 + %s705_s16]] }
  0x78   : > { %s707_s17 = sld [smem:[#allocation6 + %s705_s16]] }
  0x7d   : > { %s708_s21 = scalar_lea.vmem %s1746_s3, %s706_s19 }
  0x7e   : > { %v728_v12 = vld [vmem:[%s708_s21] sm:$0x1] }
  0x7f   : > { %1336 = vst [vmem:[%s1630_s26 + $0x6] sm:$0x1] %v728_v12 }
  0x80   : > { %754 = vsyncadd [#allocation3 + $0x6], 16  ;;  %s755_s8 = scalar_lea.vmem %s1747_s4, %s707_s17 }
  0x81   : > { %v775_v13 = vld [vmem:[%s755_s8] sm:$0x1] }
  0x82   : > { %776 = vst [vmem:[#allocation2 + $0x6] sm:$0x1] %v775_v13 }
  0x83   : > { %801 = vsyncadd [#allocation3 + $0xe], 16  ;;  %s802_s25 = sadd.s32 7, %s1615_s14 }
  0x84   : > { %s803_s0 = sld [smem:[#allocation5 + %s802_s25]] }
  0x85   : > { %s804_s9 = sld [smem:[#allocation6 + %s802_s25]] }
  0x8a   : > { %s805_s16 = scalar_lea.vmem %s1746_s3, %s803_s0 }
  0x8b   : > { %v825_v14 = vld [vmem:[%s805_s16] sm:$0x1] }
  0x8c   : > { %1338 = vst [vmem:[%s1630_s26 + $0x7] sm:$0x1] %v825_v14 }
  0x8d   : > { %851 = vsyncadd [#allocation3 + $0x7], 16  ;;  %s852_s24 = scalar_lea.vmem %s1747_s4, %s804_s9 }
  0x8e   : > { %v872_v15 = vld [vmem:[%s852_s24] sm:$0x1] }
  0x8f   : > { %873 = vst [vmem:[#allocation2 + $0x7] sm:$0x1] %v872_v15 }
  0x90   : > { %898 = vsyncadd [#allocation3 + $0xf], 16 }
  0x91   : > { %1472 = dma.done.wait [#allocation3], 16 }
  0x92   : > { %1473 = vsyncadd [#allocation3], 4294967280 }
  0x93   : > { %1474 = dma.done.wait [#allocation3 + $0x8], 16 }
  0x94   : > { %1475 = vsyncadd [#allocation3 + $0x8], 4294967280 }
  0x95   : > { %1476 = dma.done.wait [#allocation3 + $0x1], 16 }
  0x96   : > { %1477 = vsyncadd [#allocation3 + $0x1], 4294967280 }
  0x97   : > { %1478 = dma.done.wait [#allocation3 + $0x9], 16 }
  0x98   : > { %1479 = vsyncadd [#allocation3 + $0x9], 4294967280 }
  0x99   : > { %1480 = dma.done.wait [#allocation3 + $0x2], 16 }
  0x9a   : > { %1481 = vsyncadd [#allocation3 + $0x2], 4294967280 }
  0x9b   : > { %1482 = dma.done.wait [#allocation3 + $0xa], 16 }
  0x9c   : > { %1483 = vsyncadd [#allocation3 + $0xa], 4294967280 }
  0x9d   : > { %1484 = dma.done.wait [#allocation3 + $0x3], 16 }
  0x9e   : > { %1485 = vsyncadd [#allocation3 + $0x3], 4294967280 }
  0x9f   : > { %1486 = dma.done.wait [#allocation3 + $0xb], 16 }
  0xa0   : > { %1487 = vsyncadd [#allocation3 + $0xb], 4294967280 }
  0xa1   : > { %1488 = dma.done.wait [#allocation3 + $0x4], 16 }
  0xa2   : > { %1489 = vsyncadd [#allocation3 + $0x4], 4294967280 }
  0xa3   : > { %1490 = dma.done.wait [#allocation3 + $0xc], 16 }
  0xa4   : > { %1491 = vsyncadd [#allocation3 + $0xc], 4294967280 }
  0xa5   : > { %1492 = dma.done.wait [#allocation3 + $0x5], 16 }
  0xa6   : > { %1493 = vsyncadd [#allocation3 + $0x5], 4294967280 }
  0xa7   : > { %1494 = dma.done.wait [#allocation3 + $0xd], 16 }
  0xa8   : > { %1495 = vsyncadd [#allocation3 + $0xd], 4294967280 }
  0xa9   : > { %1496 = dma.done.wait [#allocation3 + $0x6], 16 }
  0xaa   : > { %1497 = vsyncadd [#allocation3 + $0x6], 4294967280 }
  0xab   : > { %1498 = dma.done.wait [#allocation3 + $0xe], 16 }
  0xac   : > { %1499 = vsyncadd [#allocation3 + $0xe], 4294967280 }
  0xad   : > { %1500 = dma.done.wait [#allocation3 + $0x7], 16 }
  0xae   : > { %1501 = vsyncadd [#allocation3 + $0x7], 4294967280 }
  0xaf   : > { %1502 = dma.done.wait [#allocation3 + $0xf], 16 }
  0xb0   : > { %1503 = vsyncadd [#allocation3 + $0xf], 4294967280  ;;  %v1526_v16 = vmov 0   ;;  %v934_v17 = vld [vmem:[%s1625_s22] sm:$0xff]  ;;  %v932_v20 = vld [vmem:[%s1630_s26] sm:$0xff]  ;;  %s1340_s14 = sshll.u32 %s1585_s30, 7 }
  0xb1   : > { %1401 = vset.pattern.permute.xlu0 %v1526_v16  ;;  %v933_v18 = vld [vmem:[#allocation2] sm:$0xff]  ;;  %s958_s17 = sshll.u32 %s1630_s26, 4  ;;  %vm942_vm0 = vcmask 261120   ;;  %s1699_s6 = scalar_lea.hbm %s1748_s5, %s1340_s14  ;;  %s1701_s17 = int_to_ptr.vmem [resolvable:$true] %s958_s17 }
  0xb2   : > { %937 = vperm.xlu0 %1401, %v934_v17   ;;  %s945_s22 = scalar_lea.sflag [#allocation8], %s119_s13  ;;  %s1426_s8 = scalar_lea.vmem %s1701_s17, 128 }
  0xb3   : > { %p1427_p7 = scmp.ne.s32.totalorder %s1701_s17, %s1426_s8  ;;  %s1527_s30 = smov [#allocation7]  }
  0xb4   : > { %s1430_s25 = sshll.u32 %s1527_s30, 4  ;;  %s1431_s25 = int_to_ptr.vmem [resolvable:$false] %s1430_s25 }
  0xb5   : > { %p1428_p8 = pnand %p1427_p7, %p1602_p1  ;;  %s1432_s0 = scalar_lea.vmem %s1431_s25, 256 }
  0xb6   : > { %p1433_p10 = scmp.lt.s32.totalorder %s1701_s17, %s1431_s25  ;;  %p1434_p11 = scmp.lt.s32.totalorder %s1432_s0, %s1426_s8 }
  0xb7   : > { %p1429_p9 = pneg %p1428_p8 }
  0xb8   : > { %p1435_p12 = por %p1434_p11, %p1433_p10 }
  0xba   : > { %p1436_p13 = pnand %p1435_p12, %p1429_p9 }
 0x131   : > { %v938_v19 = vpop.permute.xlu0 %937 }
 0x132   : > { %v940_v21 = vmul.f32 %v938_v19, %v933_v18 }
 0x134   : > { %v941_v22 = vadd.f32 %v940_v21, %v932_v20 }
 0x136   : > { %943 = vst.msk [vmem:[%s1630_s26] sm:$0xff] %vm942_vm0, %v941_v22 }
 0x137   : > { %1439 = shalt.err (!%p1436_p13)
}
 0x138   : > { %s1440_s13 = scalar_lea.hbm %s1699_s6, 128  ;;  %s1444_s20 = scalar_lea.hbm %s1748_s5, 256 }
 0x139   : > { %p1441_p0 = scmp.ne.s32.totalorder %s1699_s6, %s1440_s13  ;;  %p1445_p5 = scmp.lt.u32.totalorder %s1699_s6, %s1748_s5 }
 0x13a   : > { %p1446_p6 = scmp.lt.u32.totalorder %s1444_s20, %s1440_s13  ;;  %p1448_p8 = scmp.lt.u32.totalorder %s1440_s13, %s1699_s6 }
 0x13b   : > { %p1442_p3 = pnand %p1441_p0, %p1602_p1 }
 0x13c   : > { %p1447_p7 = por %p1446_p6, %p1445_p5 }
 0x13d   : > { %p1443_p4 = pneg %p1442_p3 }
 0x13e   : > { %p1449_p9 = por %p1448_p8, %p1447_p7 }
 0x140   : > { %p1450_p10 = pnand %p1449_p9, %p1443_p4 }
 0x142   : > { %1453 = shalt.err (!%p1450_p10)
}
 0x143   : > { %1359 = dma.vmem_to_hbm [thread:$0]  (%p1602_p1), %s1701_s17, 128, %s1699_s6, %s945_s22  }
 0x144 PF: > { %p1365_p11 = scmp.ge.s32.totalorder %s1522_s29, 2  ;;  %s970_s19 = sand.u32 1, %s1510_s1  }
 0x145   : > { %s971_s23 = scalar_lea.sflag [#allocation8], %s970_s19 }
 0x146   : > { %p1362_p12 = pnand %p1365_p11, %p1606_p2 }
 0x148   : > { %1505 = dma.done.wait (!%p1362_p12), %s971_s23, 128  }
 0x149   : > { %1507 = vsyncadd (!%p1362_p12), %s971_s23, 4294967168  ;;  %p25_p13 = scmp.ge.s32.totalorder %s1589_s7, 4   ;;  %s1752_s1 = smov %s1514_s27 }
 0x14a   : > { %s1753_s27 = smov %s1518_s28  ;;  %s1754_s28 = smov %s1600_s10 }
 0x14b   : > { %s1755_s29 = smov %s1589_s7  ;;  %27 = sbr.rel (!%p25_p13) target bundleno = 28 (0x1c), region = 759 }
 0x152   :  { %976 = vsyncpa [#allocation8], 1 }
 0x153   :  { %978 = vsyncpa [#allocation8 + $0x1], 1 }
 0x154   :  { %979 = vsyncmov [#allocation3] }
 0x157   :  { %s980_s29 = vpop.sfrf %979 }
 0x158   :  { %p1343_p1 = scmp.ne.s32.totalorder %s980_s29, 0 }
 0x15a   :  { %984 = shalt.err (%p1343_p1)  }
 0x15b   :  { %986 = vsyncmov [#allocation3 + $0x1] }
 0x15e   :  { %s987_s11 = vpop.sfrf %986 }
 0x15f   :  { %p1344_p2 = scmp.ne.s32.totalorder %s987_s11, 0 }
 0x161   :  { %991 = shalt.err (%p1344_p2)  }
 0x162   :  { %993 = vsyncmov [#allocation3 + $0x2] }
 0x165   :  { %s994_s12 = vpop.sfrf %993 }
 0x166   :  { %p1345_p0 = scmp.ne.s32.totalorder %s994_s12, 0 }
 0x168   :  { %998 = shalt.err (%p1345_p0)  }
 0x169   :  { %1000 = vsyncmov [#allocation3 + $0x3] }
 0x16c   :  { %s1001_s24 = vpop.sfrf %1000 }
 0x16d   :  { %p1346_p3 = scmp.ne.s32.totalorder %s1001_s24, 0 }
 0x16f   :  { %1005 = shalt.err (%p1346_p3)  }
 0x170   :  { %1007 = vsyncmov [#allocation3 + $0x4] }
 0x173   :  { %s1008_s7 = vpop.sfrf %1007 }
 0x174   :  { %p1347_p4 = scmp.ne.s32.totalorder %s1008_s7, 0 }
 0x176   :  { %1012 = shalt.err (%p1347_p4)  }
 0x177   :  { %1014 = vsyncmov [#allocation3 + $0x5] }
 0x17a   :  { %s1015_s2 = vpop.sfrf %1014 }
 0x17b   :  { %p1348_p5 = scmp.ne.s32.totalorder %s1015_s2, 0 }
 0x17d   :  { %1019 = shalt.err (%p1348_p5)  }
 0x17e   :  { %1021 = vsyncmov [#allocation3 + $0x6] }
 0x181   :  { %s1022_s3 = vpop.sfrf %1021 }
 0x182   :  { %p1349_p6 = scmp.ne.s32.totalorder %s1022_s3, 0 }
 0x184   :  { %1026 = shalt.err (%p1349_p6)  }
 0x185   :  { %1028 = vsyncmov [#allocation3 + $0x7] }
 0x188   :  { %s1029_s4 = vpop.sfrf %1028 }
 0x189   :  { %p1350_p7 = scmp.ne.s32.totalorder %s1029_s4, 0 }
 0x18b   :  { %1033 = shalt.err (%p1350_p7)  }
 0x18c   :  { %1035 = vsyncmov [#allocation3 + $0x8] }
 0x18f   :  { %s1036_s5 = vpop.sfrf %1035 }
 0x190   :  { %p1351_p8 = scmp.ne.s32.totalorder %s1036_s5, 0 }
 0x192   :  { %1040 = shalt.err (%p1351_p8)  }
 0x193   :  { %1042 = vsyncmov [#allocation3 + $0x9] }
 0x196   :  { %s1043_s1 = vpop.sfrf %1042 }
 0x197   :  { %p1352_p9 = scmp.ne.s32.totalorder %s1043_s1, 0 }
 0x199   :  { %1047 = shalt.err (%p1352_p9)  }
 0x19a   :  { %1049 = vsyncmov [#allocation3 + $0xa] }
 0x19d   :  { %s1050_s27 = vpop.sfrf %1049 }
 0x19e   :  { %p1353_p10 = scmp.ne.s32.totalorder %s1050_s27, 0 }
 0x1a0   :  { %1054 = shalt.err (%p1353_p10)  }
 0x1a1   :  { %1056 = vsyncmov [#allocation3 + $0xb] }
 0x1a4   :  { %s1057_s28 = vpop.sfrf %1056 }
 0x1a5   :  { %p1354_p11 = scmp.ne.s32.totalorder %s1057_s28, 0 }
 0x1a7   :  { %1061 = shalt.err (%p1354_p11)  }
 0x1a8   :  { %1063 = vsyncmov [#allocation3 + $0xc] }
 0x1ab   :  { %s1064_s10 = vpop.sfrf %1063 }
 0x1ac   :  { %p1355_p12 = scmp.ne.s32.totalorder %s1064_s10, 0 }
 0x1ae   :  { %1068 = shalt.err (%p1355_p12)  }
 0x1af   :  { %1070 = vsyncmov [#allocation3 + $0xd] }
 0x1b2   :  { %s1071_s14 = vpop.sfrf %1070 }
 0x1b3   :  { %p1356_p13 = scmp.ne.s32.totalorder %s1071_s14, 0 }
 0x1b5   :  { %1075 = shalt.err (%p1356_p13)  }
 0x1b6   :  { %1077 = vsyncmov [#allocation3 + $0xe] }
 0x1b9   :  { %s1078_s17 = vpop.sfrf %1077 }
 0x1ba   :  { %p1357_p1 = scmp.ne.s32.totalorder %s1078_s17, 0 }
 0x1bc   :  { %1082 = shalt.err (%p1357_p1)  }
 0x1bd   :  { %1084 = vsyncmov [#allocation3 + $0xf] }
 0x1c0   :  { %s1085_s21 = vpop.sfrf %1084 }
 0x1c1   :  { %p1358_p2 = scmp.ne.s32.totalorder %s1085_s21, 0 }
 0x1c3   :  { %1089 = shalt.err (%p1358_p2)  }

</bundles_post_ra>
